<compile_context>
chip_gen: v7x
topology: tpu7x:2x2x1
jax: 0.10.0
libtpu: 0.0.40
codegen_flags: <defaults>
</compile_context>

<pallas_src>
import math

import jax
import jax.numpy as jnp
from jax.experimental import pallas as pl
from jax.experimental.pallas import tpu as pltpu

# --- small synthetic dimensions consistent with the module's forward ---
B = 2             # batch
S = 8             # max_seq_len
H = 32            # encoder hidden size
FF = 64           # encoder FFN width
HEAD_HIDDEN = 32  # FeedForward head hidden size
NUM_CLASSES = 2   # self.num_classes = 2
VOCAB = 100
NUM_LAYERS = 2
LOGITS_PAD = 128  # lane-dense logits store; sliced back to NUM_CLASSES inside the jit
BS = B * S
VOCAB_PAD = 128   # embedding table padded to a full lane tile for the one-hot matmul

assert S & (S - 1) == 0, "block-diagonal mask uses a shift; S must be a power of two"
LOG2_S = S.bit_length() - 1

# ---- bf16 weight-slab row layout (every matrix starts at lane 0 -> lane/tile aligned) ----
W_WEMB = 0                                   # (VOCAB_PAD, H)
W_LAYER_BASE = VOCAB_PAD
W_Q, W_K, W_V, W_O = 0, H, 2 * H, 3 * H      # each (H, H)
W_FF1 = 4 * H                                # (H, FF)
W_FF2 = 5 * H                                # (FF, H)
W_LAYER_STRIDE = 5 * H + FF                  # 224 rows per layer
W_HEAD1 = W_LAYER_BASE + NUM_LAYERS * W_LAYER_STRIDE   # (H, HEAD_HIDDEN)
W_HEAD2 = W_HEAD1 + H                                  # (HEAD_HIDDEN, LOGITS_PAD)
W_ROWS = W_HEAD2 + HEAD_HIDDEN                         # 640

# ---- f32 slab row layout (one vector per row, cols start at lane 0) ----
F_POS = 0                                    # (BS, H) positions, pre-tiled over the batch
F_LAYER_BASE = BS
F_LAYER_STRIDE = 16
V_BQ, V_BK, V_BV, V_BO, V_B1, V_B2, V_G1, V_BE1, V_G2, V_BE2 = range(10)
F_HB1 = F_LAYER_BASE + NUM_LAYERS * F_LAYER_STRIDE     # (1, HEAD_HIDDEN)
F_HB2 = F_HB1 + 1                                      # (1, LOGITS_PAD)
F_ROWS = 56


def _layernorm(x, gamma, beta, eps=1e-12):
    mean = jnp.mean(x, axis=-1, keepdims=True)
    var = jnp.mean((x - mean) ** 2, axis=-1, keepdims=True)
    return (x - mean) * jax.lax.rsqrt(var + eps) * gamma + beta


# ---------------------------------------------------------------------------
# Fused Pallas kernel: embedding + full encoder + mask bias + CLS pooler + head
# ---------------------------------------------------------------------------
def fused_forward_kernel(ids_ref, masks_ref, w_ref, f_ref, out_ref):
    scale = 1.0 / math.sqrt(H)

    # ---- embedding lookup as a one-hot matmul on the (otherwise idle) MXU ----
    ids = ids_ref[...]                                                    # (BS, 1) int32
    vocab_iota = jax.lax.broadcasted_iota(jnp.int32, (BS, VOCAB_PAD), 1)
    onehot = jnp.where(vocab_iota == ids, 1.0, 0.0).astype(jnp.bfloat16)  # (BS, VOCAB_PAD)
    x = jnp.dot(onehot, w_ref[W_WEMB:W_WEMB + VOCAB_PAD, 0:H],
                preferred_element_type=jnp.float32)                       # (BS, H) f32
    x = x + f_ref[F_POS:F_POS + BS, 0:H]                                  # pre-tiled positions

    # ---- mask -> additive bias; block-diagonal keeps attention inside each sequence ----
    row_blk = jax.lax.broadcasted_iota(jnp.int32, (BS, BS), 0) >> LOG2_S
    col_blk = jax.lax.broadcasted_iota(jnp.int32, (BS, BS), 1) >> LOG2_S
    key_ok = masks_ref[...] > 0.0                                         # (1, BS)
    bias = jnp.where(jnp.logical_and(row_blk == col_blk, key_ok), 0.0, -1e9)  # (BS, BS) f32

    for l in range(NUM_LAYERS):                                           # static unroll
        wb = W_LAYER_BASE + l * W_LAYER_STRIDE
        fb = F_LAYER_BASE + l * F_LAYER_STRIDE

        def w(off, rows, cols, _wb=wb):
            return w_ref[_wb + off:_wb + off + rows, 0:cols]              # static slice, free

        def vec(i, n, _fb=fb):
            return f_ref[_fb + i:_fb + i + 1, 0:n]                        # (1, n) f32 row

        xb = x.astype(jnp.bfloat16)                                       # cast once per layer
        q = jnp.dot(xb, w(W_Q, H, H), preferred_element_type=jnp.float32) + vec(V_BQ, H)
        k = jnp.dot(xb, w(W_K, H, H), preferred_element_type=jnp.float32) + vec(V_BK, H)
        v = jnp.dot(xb, w(W_V, H, H), preferred_element_type=jnp.float32) + vec(V_BV, H)

        # flat (BS, BS) scores: contract the head dim directly (no materialized transpose)
        scores = jax.lax.dot_general(
            q.astype(jnp.bfloat16), k.astype(jnp.bfloat16),
            (((1,), (1,)), ((), ())),
            preferred_element_type=jnp.float32) * scale + bias            # (BS, BS)

        # explicit softmax in f32; divide pushed to the EUP via approx reciprocal
        m = jnp.max(scores, axis=-1, keepdims=True)
        e = jnp.exp(scores - m)
        probs = e * pl.reciprocal(jnp.sum(e, axis=-1, keepdims=True), approx=True)

        ctx = jnp.dot(probs.astype(jnp.bfloat16), v.astype(jnp.bfloat16),
                      preferred_element_type=jnp.float32)                 # (BS, H)
        attn = jnp.dot(ctx.astype(jnp.bfloat16), w(W_O, H, H),
                       preferred_element_type=jnp.float32) + vec(V_BO, H)
        h = _layernorm(x + attn, vec(V_G1, H), vec(V_BE1, H))             # post-LN residual

        ff = jax.nn.gelu(jnp.dot(h.astype(jnp.bfloat16), w(W_FF1, H, FF),
                                 preferred_element_type=jnp.float32) + vec(V_B1, FF))
        ff = jnp.dot(ff.astype(jnp.bfloat16), w(W_FF2, FF, H),
                     preferred_element_type=jnp.float32) + vec(V_B2, H)
        x = _layernorm(h + ff, vec(V_G2, H), vec(V_BE2, H))

    # ---- default pooler: CLS token of each sequence, then FeedForward head ----
    cls = jnp.concatenate([x[b * S:b * S + 1, :] for b in range(B)], axis=0)   # (B, H)
    hid = jnp.dot(cls.astype(jnp.bfloat16), w_ref[W_HEAD1:W_HEAD1 + H, 0:HEAD_HIDDEN],
                  preferred_element_type=jnp.float32) + f_ref[F_HB1:F_HB1 + 1, 0:HEAD_HIDDEN]
    hid = jnp.maximum(hid, 0.0)                                            # ReLU
    out_ref[...] = jnp.dot(hid.astype(jnp.bfloat16),
                           w_ref[W_HEAD2:W_HEAD2 + HEAD_HIDDEN, 0:LOGITS_PAD],
                           preferred_element_type=jnp.float32) + f_ref[F_HB2:F_HB2 + 1, 0:LOGITS_PAD]


def run_fused_forward(wslab, fslab, ids_col, masks_row):
    # Single block, no grid: everything is VMEM-resident for the whole kernel.
    return pl.pallas_call(
        fused_forward_kernel,
        out_shape=jax.ShapeDtypeStruct((B, LOGITS_PAD), jnp.float32),
        in_specs=[pl.BlockSpec(memory_space=pltpu.MemorySpace.VMEM)] * 4,
        out_specs=pl.BlockSpec(memory_space=pltpu.MemorySpace.VMEM),
        cost_estimate=pl.CostEstimate(flops=1_000_000, transcendentals=3_000,
                                      bytes_accessed=200_000),
    )(ids_col, masks_row, wslab, fslab)


# ---------------------------------------------------------------------------
# Parameter initialization: pack everything into two slabs
# ---------------------------------------------------------------------------
def init_params(key):
    def dense(k, fan_in, fan_out):
        return jax.random.normal(k, (fan_in, fan_out), jnp.float32) * (1.0 / math.sqrt(fan_in))

    def put(slab, row, mat):
        return slab.at[row:row + mat.shape[0], 0:mat.shape[1]].set(mat)

    keys = jax.random.split(key, 4 + NUM_LAYERS)
    word_emb = jax.random.normal(keys[0], (VOCAB, H), jnp.float32) * 0.02
    pos_emb = jax.random.normal(keys[1], (S, H), jnp.float32) * 0.02
    head_w1 = dense(keys[2], H, HEAD_HIDDEN)
    head_w2 = dense(keys[3], HEAD_HIDDEN, NUM_CLASSES)        # padded to 128 lanes in the slab

    wslab = jnp.zeros((W_ROWS, 128), jnp.float32)
    fslab = jnp.zeros((F_ROWS, 128), jnp.float32)

    wslab = put(wslab, W_WEMB, jnp.pad(word_emb, ((0, VOCAB_PAD - VOCAB), (0, 0))))
    fslab = put(fslab, F_POS, jnp.tile(pos_emb, (B, 1)))      # positions pre-tiled over batch

    for l in range(NUM_LAYERS):
        lk = jax.random.split(keys[4 + l], 6)
        wb = W_LAYER_BASE + l * W_LAYER_STRIDE
        fb = F_LAYER_BASE + l * F_LAYER_STRIDE
        wslab = put(wslab, wb + W_Q, dense(lk[0], H, H))
        wslab = put(wslab, wb + W_K, dense(lk[1], H, H))
        wslab = put(wslab, wb + W_V, dense(lk[2], H, H))
        wslab = put(wslab, wb + W_O, dense(lk[3], H, H))
        wslab = put(wslab, wb + W_FF1, dense(lk[4], H, FF))
        wslab = put(wslab, wb + W_FF2, dense(lk[5], FF, H))
        # biases stay zero; LayerNorm gammas are one
        fslab = fslab.at[fb + V_G1, 0:H].set(1.0)
        fslab = fslab.at[fb + V_G2, 0:H].set(1.0)

    wslab = put(wslab, W_HEAD1, head_w1)
    wslab = put(wslab, W_HEAD2, head_w2)                      # cols NUM_CLASSES..127 stay zero

    return {"wslab": wslab.astype(jnp.bfloat16), "fslab": fslab}


# ---------------------------------------------------------------------------
# SentimentClassifier.forward (everything inside jax.jit)
# ---------------------------------------------------------------------------
def _logits(wslab, fslab, input_ids, masks):
    ids_col = input_ids.reshape(BS, 1).astype(jnp.int32)
    masks_row = masks.reshape(1, BS).astype(jnp.float32)
    return run_fused_forward(wslab, fslab, ids_col, masks_row)[:, :NUM_CLASSES]


@jax.jit
def _forward_infer(wslab, fslab, input_ids, masks):
    return _logits(wslab, fslab, input_ids, masks)


@jax.jit
def _forward_train(wslab, fslab, input_ids, masks, labels):
    logits = _logits(wslab, fslab, input_ids, masks)
    # nn.CrossEntropyLoss (mean) + accuracy: tiny (B, NUM_CLASSES) reductions, fused in the jit
    logp = jax.nn.log_softmax(logits, axis=-1)
    loss = -jnp.mean(jnp.take_along_axis(logp, labels[:, None], axis=1))
    acc = jnp.mean((jnp.argmax(logits, axis=1) == labels).astype(jnp.float32))
    return logits, loss, acc


def sentiment_classifier_forward(params, input_ids, masks=None, labels=None):
    # TODO(synk): custom_params / domains paths of the original module are not implemented.
    if masks is None:
        masks = jnp.ones_like(input_ids)                      # torch.ones_like(x)
    if labels is None:
        logits = _forward_infer(params["wslab"], params["fslab"], input_ids, masks)
        return {"logits": logits}
    logits, loss, acc = _forward_train(params["wslab"], params["fslab"], input_ids, masks, labels)
    # accuracy() in the reference calls .item(); keep it as a device scalar to avoid a host sync.
    return {"logits": logits, "loss": loss, "acc": acc}


if __name__ == "__main__":
    key = jax.random.PRNGKey(0)
    pkey, ikey, lkey = jax.random.split(key, 3)

    params = init_params(pkey)
    input_ids = jax.random.randint(ikey, (B, S), 0, VOCAB, dtype=jnp.int32)
    labels = jax.random.randint(lkey, (B,), 0, NUM_CLASSES, dtype=jnp.int32)

    out = sentiment_classifier_forward(params, input_ids, masks=None, labels=labels)
    jax.block_until_ready(out)

    assert out["logits"].shape == (B, NUM_CLASSES)
    assert out["loss"].shape == ()
    assert out["acc"].shape == ()
    print("KERNEL_OK")
</pallas_src>

<mosaic_0001>
module attributes {stable_mosaic.version = 11 : i64} {
  func.func @fused_forward_kernel(%arg0: memref<16x1xi32, #tpu.memory_space<vmem>>, %arg1: memref<1x16xf32, #tpu.memory_space<vmem>>, %arg2: memref<640x128xbf16, #tpu.memory_space<vmem>>, %arg3: memref<56x128xf32, #tpu.memory_space<vmem>>, %arg4: memref<2x128xf32, #tpu.memory_space<vmem>>) attributes {dimension_semantics = [], scalar_prefetch = 0 : i64, scratch_operands = 0 : i64, tpu.core_type = #tpu.core_type<tc>} {
    %c0 = arith.constant 0 : index
    %c0_0 = arith.constant 0 : index
    %0 = vector.load %arg0[%c0, %c0_0] : memref<16x1xi32, #tpu.memory_space<vmem>>, vector<16x1xi32>
    %1 = tpu.iota {dimensions = array<i32: 1>} : vector<16x128xi32>
    %2 = vector.broadcast %0 : vector<16x1xi32> to vector<16x128xi32>
    %3 = arith.cmpi eq, %1, %2 : vector<16x128xi32>
    %cst = arith.constant 1.000000e+00 : f32
    %cst_1 = arith.constant 0.000000e+00 : f32
    %4 = vector.broadcast %cst : f32 to vector<16x128xf32>
    %5 = vector.broadcast %cst_1 : f32 to vector<16x128xf32>
    %6 = arith.select %3, %4, %5 : vector<16x128xi1>, vector<16x128xf32>
    %7 = arith.truncf %6 : vector<16x128xf32> to vector<16x128xbf16>
    %c0_2 = arith.constant 0 : index
    %c0_3 = arith.constant 0 : index
    %8 = vector.load %arg2[%c0_2, %c0_3] : memref<640x128xbf16, #tpu.memory_space<vmem>>, vector<128x32xbf16>
    %cst_4 = arith.constant dense<0.000000e+00> : vector<16x32xf32>
    %9 = tpu.matmul %7, %8, %cst_4 {dimension_numbers = #tpu.dot_dimension_numbers<[1], [0], [0], [1], [0, 0, 1, 1], [], []>} : vector<16x128xbf16>, vector<128x32xbf16>, vector<16x32xf32> -> vector<16x32xf32>
    %c0_5 = arith.constant 0 : index
    %c0_6 = arith.constant 0 : index
    %10 = vector.load %arg3[%c0_5, %c0_6] : memref<56x128xf32, #tpu.memory_space<vmem>>, vector<16x32xf32>
    %11 = arith.addf %9, %10 : vector<16x32xf32>
    %12 = tpu.iota {dimensions = array<i32: 0>} : vector<16x16xi32>
    %c3_i32 = arith.constant 3 : i32
    %13 = vector.broadcast %c3_i32 : i32 to vector<16x16xi32>
    %14 = arith.shrsi %12, %13 : vector<16x16xi32>
    %15 = tpu.iota {dimensions = array<i32: 1>} : vector<16x16xi32>
    %c3_i32_7 = arith.constant 3 : i32
    %16 = vector.broadcast %c3_i32_7 : i32 to vector<16x16xi32>
    %17 = arith.shrsi %15, %16 : vector<16x16xi32>
    %c0_8 = arith.constant 0 : index
    %c0_9 = arith.constant 0 : index
    %18 = vector.load %arg1[%c0_8, %c0_9] : memref<1x16xf32, #tpu.memory_space<vmem>>, vector<1x16xf32>
    %cst_10 = arith.constant 0.000000e+00 : f32
    %19 = vector.broadcast %cst_10 : f32 to vector<1x16xf32>
    %20 = arith.cmpf ogt, %18, %19 : vector<1x16xf32>
    %21 = arith.cmpi eq, %14, %17 : vector<16x16xi32>
    %22 = vector.broadcast %20 : vector<1x16xi1> to vector<16x16xi1>
    %23 = arith.andi %21, %22 : vector<16x16xi1>
    %cst_11 = arith.constant 0.000000e+00 : f32
    %cst_12 = arith.constant -1.000000e+09 : f32
    %24 = vector.broadcast %cst_11 : f32 to vector<16x16xf32>
    %25 = vector.broadcast %cst_12 : f32 to vector<16x16xf32>
    %26 = arith.select %23, %24, %25 : vector<16x16xi1>, vector<16x16xf32>
    %27 = arith.truncf %11 : vector<16x32xf32> to vector<16x32xbf16>
    %c128 = arith.constant 128 : index
    %c0_13 = arith.constant 0 : index
    %28 = vector.load %arg2[%c128, %c0_13] : memref<640x128xbf16, #tpu.memory_space<vmem>>, vector<32x32xbf16>
    %cst_14 = arith.constant dense<0.000000e+00> : vector<16x32xf32>
    %29 = tpu.matmul %27, %28, %cst_14 {dimension_numbers = #tpu.dot_dimension_numbers<[1], [0], [0], [1], [0, 0, 1, 1], [], []>} : vector<16x32xbf16>, vector<32x32xbf16>, vector<16x32xf32> -> vector<16x32xf32>
    %c16 = arith.constant 16 : index
    %c0_15 = arith.constant 0 : index
    %30 = vector.load %arg3[%c16, %c0_15] : memref<56x128xf32, #tpu.memory_space<vmem>>, vector<1x32xf32>
    %31 = vector.broadcast %30 : vector<1x32xf32> to vector<16x32xf32>
    %32 = arith.addf %29, %31 : vector<16x32xf32>
    %c160 = arith.constant 160 : index
    %c0_16 = arith.constant 0 : index
    %33 = vector.load %arg2[%c160, %c0_16] : memref<640x128xbf16, #tpu.memory_space<vmem>>, vector<32x32xbf16>
    %cst_17 = arith.constant dense<0.000000e+00> : vector<16x32xf32>
    %34 = tpu.matmul %27, %33, %cst_17 {dimension_numbers = #tpu.dot_dimension_numbers<[1], [0], [0], [1], [0, 0, 1, 1], [], []>} : vector<16x32xbf16>, vector<32x32xbf16>, vector<16x32xf32> -> vector<16x32xf32>
    %c17 = arith.constant 17 : index
    %c0_18 = arith.constant 0 : index
    %35 = vector.load %arg3[%c17, %c0_18] : memref<56x128xf32, #tpu.memory_space<vmem>>, vector<1x32xf32>
    %36 = vector.broadcast %35 : vector<1x32xf32> to vector<16x32xf32>
    %37 = arith.addf %34, %36 : vector<16x32xf32>
    %c192 = arith.constant 192 : index
    %c0_19 = arith.constant 0 : index
    %38 = vector.load %arg2[%c192, %c0_19] : memref<640x128xbf16, #tpu.memory_space<vmem>>, vector<32x32xbf16>
    %cst_20 = arith.constant dense<0.000000e+00> : vector<16x32xf32>
    %39 = tpu.matmul %27, %38, %cst_20 {dimension_numbers = #tpu.dot_dimension_numbers<[1], [0], [0], [1], [0, 0, 1, 1], [], []>} : vector<16x32xbf16>, vector<32x32xbf16>, vector<16x32xf32> -> vector<16x32xf32>
    %c18 = arith.constant 18 : index
    %c0_21 = arith.constant 0 : index
    %40 = vector.load %arg3[%c18, %c0_21] : memref<56x128xf32, #tpu.memory_space<vmem>>, vector<1x32xf32>
    %41 = vector.broadcast %40 : vector<1x32xf32> to vector<16x32xf32>
    %42 = arith.addf %39, %41 : vector<16x32xf32>
    %43 = arith.truncf %32 : vector<16x32xf32> to vector<16x32xbf16>
    %44 = arith.truncf %37 : vector<16x32xf32> to vector<16x32xbf16>
    %cst_22 = arith.constant dense<0.000000e+00> : vector<16x16xf32>
    %45 = tpu.matmul %43, %44, %cst_22 {dimension_numbers = #tpu.dot_dimension_numbers<[1], [1], [0], [0], [0, 0, 1, 0], [], []>} : vector<16x32xbf16>, vector<16x32xbf16>, vector<16x16xf32> -> vector<16x16xf32>
    %cst_23 = arith.constant 0.176776692 : f32
    %46 = vector.broadcast %cst_23 : f32 to vector<16x16xf32>
    %47 = arith.mulf %45, %46 : vector<16x16xf32>
    %48 = arith.addf %47, %26 : vector<16x16xf32>
    %cst_24 = arith.constant dense<0xFF800000> : vector<16xf32>
    %49 = vector.multi_reduction <maximumf>, %48, %cst_24 [1] : vector<16x16xf32> to vector<16xf32>
    %50 = vector.shape_cast %49 : vector<16xf32> to vector<16x1xf32>
    %51 = vector.broadcast %50 : vector<16x1xf32> to vector<16x16xf32>
    %52 = arith.subf %48, %51 : vector<16x16xf32>
    %53 = math.exp %52 : vector<16x16xf32>
    %cst_25 = arith.constant dense<0.000000e+00> : vector<16xf32>
    %54 = vector.multi_reduction <add>, %53, %cst_25 [1] : vector<16x16xf32> to vector<16xf32>
    %55 = vector.shape_cast %54 : vector<16xf32> to vector<16x1xf32>
    %56 = tpu.reciprocal %55 {approx = true} : vector<16x1xf32> -> vector<16x1xf32>
    %57 = vector.broadcast %56 : vector<16x1xf32> to vector<16x16xf32>
    %58 = arith.mulf %53, %57 : vector<16x16xf32>
    %59 = arith.truncf %58 : vector<16x16xf32> to vector<16x16xbf16>
    %60 = arith.truncf %42 : vector<16x32xf32> to vector<16x32xbf16>
    %cst_26 = arith.constant dense<0.000000e+00> : vector<16x32xf32>
    %61 = tpu.matmul %59, %60, %cst_26 {dimension_numbers = #tpu.dot_dimension_numbers<[1], [0], [0], [1], [0, 0, 1, 1], [], []>} : vector<16x16xbf16>, vector<16x32xbf16>, vector<16x32xf32> -> vector<16x32xf32>
    %62 = arith.truncf %61 : vector<16x32xf32> to vector<16x32xbf16>
    %c224 = arith.constant 224 : index
    %c0_27 = arith.constant 0 : index
    %63 = vector.load %arg2[%c224, %c0_27] : memref<640x128xbf16, #tpu.memory_space<vmem>>, vector<32x32xbf16>
    %cst_28 = arith.constant dense<0.000000e+00> : vector<16x32xf32>
    %64 = tpu.matmul %62, %63, %cst_28 {dimension_numbers = #tpu.dot_dimension_numbers<[1], [0], [0], [1], [0, 0, 1, 1], [], []>} : vector<16x32xbf16>, vector<32x32xbf16>, vector<16x32xf32> -> vector<16x32xf32>
    %c19 = arith.constant 19 : index
    %c0_29 = arith.constant 0 : index
    %65 = vector.load %arg3[%c19, %c0_29] : memref<56x128xf32, #tpu.memory_space<vmem>>, vector<1x32xf32>
    %66 = vector.broadcast %65 : vector<1x32xf32> to vector<16x32xf32>
    %67 = arith.addf %64, %66 : vector<16x32xf32>
    %68 = arith.addf %11, %67 : vector<16x32xf32>
    %c22 = arith.constant 22 : index
    %c0_30 = arith.constant 0 : index
    %69 = vector.load %arg3[%c22, %c0_30] : memref<56x128xf32, #tpu.memory_space<vmem>>, vector<1x32xf32>
    %c23 = arith.constant 23 : index
    %c0_31 = arith.constant 0 : index
    %70 = vector.load %arg3[%c23, %c0_31] : memref<56x128xf32, #tpu.memory_space<vmem>>, vector<1x32xf32>
    %cst_32 = arith.constant dense<0.000000e+00> : vector<16xf32>
    %71 = vector.multi_reduction <add>, %68, %cst_32 [1] : vector<16x32xf32> to vector<16xf32>
    %72 = vector.shape_cast %71 : vector<16xf32> to vector<16x1xf32>
    %cst_33 = arith.constant 3.200000e+01 : f32
    %73 = vector.broadcast %cst_33 : f32 to vector<16x1xf32>
    %74 = arith.divf %72, %73 : vector<16x1xf32>
    %75 = vector.broadcast %74 : vector<16x1xf32> to vector<16x32xf32>
    %76 = arith.subf %68, %75 : vector<16x32xf32>
    %77 = arith.mulf %76, %76 : vector<16x32xf32>
    %cst_34 = arith.constant dense<0.000000e+00> : vector<16xf32>
    %78 = vector.multi_reduction <add>, %77, %cst_34 [1] : vector<16x32xf32> to vector<16xf32>
    %79 = vector.shape_cast %78 : vector<16xf32> to vector<16x1xf32>
    %cst_35 = arith.constant 3.200000e+01 : f32
    %80 = vector.broadcast %cst_35 : f32 to vector<16x1xf32>
    %81 = arith.divf %79, %80 : vector<16x1xf32>
    %82 = vector.broadcast %74 : vector<16x1xf32> to vector<16x32xf32>
    %83 = arith.subf %68, %82 : vector<16x32xf32>
    %cst_36 = arith.constant 9.99999996E-13 : f32
    %84 = vector.broadcast %cst_36 : f32 to vector<16x1xf32>
    %85 = arith.addf %81, %84 : vector<16x1xf32>
    %86 = math.rsqrt %85 : vector<16x1xf32>
    %87 = vector.broadcast %86 : vector<16x1xf32> to vector<16x32xf32>
    %88 = arith.mulf %83, %87 : vector<16x32xf32>
    %89 = vector.broadcast %69 : vector<1x32xf32> to vector<16x32xf32>
    %90 = arith.mulf %88, %89 : vector<16x32xf32>
    %91 = vector.broadcast %70 : vector<1x32xf32> to vector<16x32xf32>
    %92 = arith.addf %90, %91 : vector<16x32xf32>
    %93 = arith.truncf %92 : vector<16x32xf32> to vector<16x32xbf16>
    %c256 = arith.constant 256 : index
    %c0_37 = arith.constant 0 : index
    %94 = vector.load %arg2[%c256, %c0_37] : memref<640x128xbf16, #tpu.memory_space<vmem>>, vector<32x64xbf16>
    %cst_38 = arith.constant dense<0.000000e+00> : vector<16x64xf32>
    %95 = tpu.matmul %93, %94, %cst_38 {dimension_numbers = #tpu.dot_dimension_numbers<[1], [0], [0], [1], [0, 0, 1, 1], [], []>} : vector<16x32xbf16>, vector<32x64xbf16>, vector<16x64xf32> -> vector<16x64xf32>
    %c20 = arith.constant 20 : index
    %c0_39 = arith.constant 0 : index
    %96 = vector.load %arg3[%c20, %c0_39] : memref<56x128xf32, #tpu.memory_space<vmem>>, vector<1x64xf32>
    %97 = vector.broadcast %96 : vector<1x64xf32> to vector<16x64xf32>
    %98 = arith.addf %95, %97 : vector<16x64xf32>
    %99 = arith.mulf %98, %98 : vector<16x64xf32>
    %100 = arith.mulf %98, %99 : vector<16x64xf32>
    %cst_40 = arith.constant 4.471500e-02 : f32
    %101 = vector.broadcast %cst_40 : f32 to vector<16x64xf32>
    %102 = arith.mulf %101, %100 : vector<16x64xf32>
    %103 = arith.addf %98, %102 : vector<16x64xf32>
    %cst_41 = arith.constant 0.797884583 : f32
    %104 = vector.broadcast %cst_41 : f32 to vector<16x64xf32>
    %105 = arith.mulf %104, %103 : vector<16x64xf32>
    %106 = math.tanh %105 : vector<16x64xf32>
    %cst_42 = arith.constant 1.000000e+00 : f32
    %107 = vector.broadcast %cst_42 : f32 to vector<16x64xf32>
    %108 = arith.addf %107, %106 : vector<16x64xf32>
    %cst_43 = arith.constant 5.000000e-01 : f32
    %109 = vector.broadcast %cst_43 : f32 to vector<16x64xf32>
    %110 = arith.mulf %109, %108 : vector<16x64xf32>
    %111 = arith.mulf %98, %110 : vector<16x64xf32>
    %112 = arith.truncf %111 : vector<16x64xf32> to vector<16x64xbf16>
    %c288 = arith.constant 288 : index
    %c0_44 = arith.constant 0 : index
    %113 = vector.load %arg2[%c288, %c0_44] : memref<640x128xbf16, #tpu.memory_space<vmem>>, vector<64x32xbf16>
    %cst_45 = arith.constant dense<0.000000e+00> : vector<16x32xf32>
    %114 = tpu.matmul %112, %113, %cst_45 {dimension_numbers = #tpu.dot_dimension_numbers<[1], [0], [0], [1], [0, 0, 1, 1], [], []>} : vector<16x64xbf16>, vector<64x32xbf16>, vector<16x32xf32> -> vector<16x32xf32>
    %c21 = arith.constant 21 : index
    %c0_46 = arith.constant 0 : index
    %115 = vector.load %arg3[%c21, %c0_46] : memref<56x128xf32, #tpu.memory_space<vmem>>, vector<1x32xf32>
    %116 = vector.broadcast %115 : vector<1x32xf32> to vector<16x32xf32>
    %117 = arith.addf %114, %116 : vector<16x32xf32>
    %118 = arith.addf %92, %117 : vector<16x32xf32>
    %c24 = arith.constant 24 : index
    %c0_47 = arith.constant 0 : index
    %119 = vector.load %arg3[%c24, %c0_47] : memref<56x128xf32, #tpu.memory_space<vmem>>, vector<1x32xf32>
    %c25 = arith.constant 25 : index
    %c0_48 = arith.constant 0 : index
    %120 = vector.load %arg3[%c25, %c0_48] : memref<56x128xf32, #tpu.memory_space<vmem>>, vector<1x32xf32>
    %cst_49 = arith.constant dense<0.000000e+00> : vector<16xf32>
    %121 = vector.multi_reduction <add>, %118, %cst_49 [1] : vector<16x32xf32> to vector<16xf32>
    %122 = vector.shape_cast %121 : vector<16xf32> to vector<16x1xf32>
    %cst_50 = arith.constant 3.200000e+01 : f32
    %123 = vector.broadcast %cst_50 : f32 to vector<16x1xf32>
    %124 = arith.divf %122, %123 : vector<16x1xf32>
    %125 = vector.broadcast %124 : vector<16x1xf32> to vector<16x32xf32>
    %126 = arith.subf %118, %125 : vector<16x32xf32>
    %127 = arith.mulf %126, %126 : vector<16x32xf32>
    %cst_51 = arith.constant dense<0.000000e+00> : vector<16xf32>
    %128 = vector.multi_reduction <add>, %127, %cst_51 [1] : vector<16x32xf32> to vector<16xf32>
    %129 = vector.shape_cast %128 : vector<16xf32> to vector<16x1xf32>
    %cst_52 = arith.constant 3.200000e+01 : f32
    %130 = vector.broadcast %cst_52 : f32 to vector<16x1xf32>
    %131 = arith.divf %129, %130 : vector<16x1xf32>
    %132 = vector.broadcast %124 : vector<16x1xf32> to vector<16x32xf32>
    %133 = arith.subf %118, %132 : vector<16x32xf32>
    %cst_53 = arith.constant 9.99999996E-13 : f32
    %134 = vector.broadcast %cst_53 : f32 to vector<16x1xf32>
    %135 = arith.addf %131, %134 : vector<16x1xf32>
    %136 = math.rsqrt %135 : vector<16x1xf32>
    %137 = vector.broadcast %136 : vector<16x1xf32> to vector<16x32xf32>
    %138 = arith.mulf %133, %137 : vector<16x32xf32>
    %139 = vector.broadcast %119 : vector<1x32xf32> to vector<16x32xf32>
    %140 = arith.mulf %138, %139 : vector<16x32xf32>
    %141 = vector.broadcast %120 : vector<1x32xf32> to vector<16x32xf32>
    %142 = arith.addf %140, %141 : vector<16x32xf32>
    %143 = arith.truncf %142 : vector<16x32xf32> to vector<16x32xbf16>
    %c352 = arith.constant 352 : index
    %c0_54 = arith.constant 0 : index
    %144 = vector.load %arg2[%c352, %c0_54] : memref<640x128xbf16, #tpu.memory_space<vmem>>, vector<32x32xbf16>
    %cst_55 = arith.constant dense<0.000000e+00> : vector<16x32xf32>
    %145 = tpu.matmul %143, %144, %cst_55 {dimension_numbers = #tpu.dot_dimension_numbers<[1], [0], [0], [1], [0, 0, 1, 1], [], []>} : vector<16x32xbf16>, vector<32x32xbf16>, vector<16x32xf32> -> vector<16x32xf32>
    %c32 = arith.constant 32 : index
    %c0_56 = arith.constant 0 : index
    %146 = vector.load %arg3[%c32, %c0_56] : memref<56x128xf32, #tpu.memory_space<vmem>>, vector<1x32xf32>
    %147 = vector.broadcast %146 : vector<1x32xf32> to vector<16x32xf32>
    %148 = arith.addf %145, %147 : vector<16x32xf32>
    %c384 = arith.constant 384 : index
    %c0_57 = arith.constant 0 : index
    %149 = vector.load %arg2[%c384, %c0_57] : memref<640x128xbf16, #tpu.memory_space<vmem>>, vector<32x32xbf16>
    %cst_58 = arith.constant dense<0.000000e+00> : vector<16x32xf32>
    %150 = tpu.matmul %143, %149, %cst_58 {dimension_numbers = #tpu.dot_dimension_numbers<[1], [0], [0], [1], [0, 0, 1, 1], [], []>} : vector<16x32xbf16>, vector<32x32xbf16>, vector<16x32xf32> -> vector<16x32xf32>
    %c33 = arith.constant 33 : index
    %c0_59 = arith.constant 0 : index
    %151 = vector.load %arg3[%c33, %c0_59] : memref<56x128xf32, #tpu.memory_space<vmem>>, vector<1x32xf32>
    %152 = vector.broadcast %151 : vector<1x32xf32> to vector<16x32xf32>
    %153 = arith.addf %150, %152 : vector<16x32xf32>
    %c416 = arith.constant 416 : index
    %c0_60 = arith.constant 0 : index
    %154 = vector.load %arg2[%c416, %c0_60] : memref<640x128xbf16, #tpu.memory_space<vmem>>, vector<32x32xbf16>
    %cst_61 = arith.constant dense<0.000000e+00> : vector<16x32xf32>
    %155 = tpu.matmul %143, %154, %cst_61 {dimension_numbers = #tpu.dot_dimension_numbers<[1], [0], [0], [1], [0, 0, 1, 1], [], []>} : vector<16x32xbf16>, vector<32x32xbf16>, vector<16x32xf32> -> vector<16x32xf32>
    %c34 = arith.constant 34 : index
    %c0_62 = arith.constant 0 : index
    %156 = vector.load %arg3[%c34, %c0_62] : memref<56x128xf32, #tpu.memory_space<vmem>>, vector<1x32xf32>
    %157 = vector.broadcast %156 : vector<1x32xf32> to vector<16x32xf32>
    %158 = arith.addf %155, %157 : vector<16x32xf32>
    %159 = arith.truncf %148 : vector<16x32xf32> to vector<16x32xbf16>
    %160 = arith.truncf %153 : vector<16x32xf32> to vector<16x32xbf16>
    %cst_63 = arith.constant dense<0.000000e+00> : vector<16x16xf32>
    %161 = tpu.matmul %159, %160, %cst_63 {dimension_numbers = #tpu.dot_dimension_numbers<[1], [1], [0], [0], [0, 0, 1, 0], [], []>} : vector<16x32xbf16>, vector<16x32xbf16>, vector<16x16xf32> -> vector<16x16xf32>
    %cst_64 = arith.constant 0.176776692 : f32
    %162 = vector.broadcast %cst_64 : f32 to vector<16x16xf32>
    %163 = arith.mulf %161, %162 : vector<16x16xf32>
    %164 = arith.addf %163, %26 : vector<16x16xf32>
    %cst_65 = arith.constant dense<0xFF800000> : vector<16xf32>
    %165 = vector.multi_reduction <maximumf>, %164, %cst_65 [1] : vector<16x16xf32> to vector<16xf32>
    %166 = vector.shape_cast %165 : vector<16xf32> to vector<16x1xf32>
    %167 = vector.broadcast %166 : vector<16x1xf32> to vector<16x16xf32>
    %168 = arith.subf %164, %167 : vector<16x16xf32>
    %169 = math.exp %168 : vector<16x16xf32>
    %cst_66 = arith.constant dense<0.000000e+00> : vector<16xf32>
    %170 = vector.multi_reduction <add>, %169, %cst_66 [1] : vector<16x16xf32> to vector<16xf32>
    %171 = vector.shape_cast %170 : vector<16xf32> to vector<16x1xf32>
    %172 = tpu.reciprocal %171 {approx = true} : vector<16x1xf32> -> vector<16x1xf32>
    %173 = vector.broadcast %172 : vector<16x1xf32> to vector<16x16xf32>
    %174 = arith.mulf %169, %173 : vector<16x16xf32>
    %175 = arith.truncf %174 : vector<16x16xf32> to vector<16x16xbf16>
    %176 = arith.truncf %158 : vector<16x32xf32> to vector<16x32xbf16>
    %cst_67 = arith.constant dense<0.000000e+00> : vector<16x32xf32>
    %177 = tpu.matmul %175, %176, %cst_67 {dimension_numbers = #tpu.dot_dimension_numbers<[1], [0], [0], [1], [0, 0, 1, 1], [], []>} : vector<16x16xbf16>, vector<16x32xbf16>, vector<16x32xf32> -> vector<16x32xf32>
    %178 = arith.truncf %177 : vector<16x32xf32> to vector<16x32xbf16>
    %c448 = arith.constant 448 : index
    %c0_68 = arith.constant 0 : index
    %179 = vector.load %arg2[%c448, %c0_68] : memref<640x128xbf16, #tpu.memory_space<vmem>>, vector<32x32xbf16>
    %cst_69 = arith.constant dense<0.000000e+00> : vector<16x32xf32>
    %180 = tpu.matmul %178, %179, %cst_69 {dimension_numbers = #tpu.dot_dimension_numbers<[1], [0], [0], [1], [0, 0, 1, 1], [], []>} : vector<16x32xbf16>, vector<32x32xbf16>, vector<16x32xf32> -> vector<16x32xf32>
    %c35 = arith.constant 35 : index
    %c0_70 = arith.constant 0 : index
    %181 = vector.load %arg3[%c35, %c0_70] : memref<56x128xf32, #tpu.memory_space<vmem>>, vector<1x32xf32>
    %182 = vector.broadcast %181 : vector<1x32xf32> to vector<16x32xf32>
    %183 = arith.addf %180, %182 : vector<16x32xf32>
    %184 = arith.addf %142, %183 : vector<16x32xf32>
    %c38 = arith.constant 38 : index
    %c0_71 = arith.constant 0 : index
    %185 = vector.load %arg3[%c38, %c0_71] : memref<56x128xf32, #tpu.memory_space<vmem>>, vector<1x32xf32>
    %c39 = arith.constant 39 : index
    %c0_72 = arith.constant 0 : index
    %186 = vector.load %arg3[%c39, %c0_72] : memref<56x128xf32, #tpu.memory_space<vmem>>, vector<1x32xf32>
    %cst_73 = arith.constant dense<0.000000e+00> : vector<16xf32>
    %187 = vector.multi_reduction <add>, %184, %cst_73 [1] : vector<16x32xf32> to vector<16xf32>
    %188 = vector.shape_cast %187 : vector<16xf32> to vector<16x1xf32>
    %cst_74 = arith.constant 3.200000e+01 : f32
    %189 = vector.broadcast %cst_74 : f32 to vector<16x1xf32>
    %190 = arith.divf %188, %189 : vector<16x1xf32>
    %191 = vector.broadcast %190 : vector<16x1xf32> to vector<16x32xf32>
    %192 = arith.subf %184, %191 : vector<16x32xf32>
    %193 = arith.mulf %192, %192 : vector<16x32xf32>
    %cst_75 = arith.constant dense<0.000000e+00> : vector<16xf32>
    %194 = vector.multi_reduction <add>, %193, %cst_75 [1] : vector<16x32xf32> to vector<16xf32>
    %195 = vector.shape_cast %194 : vector<16xf32> to vector<16x1xf32>
    %cst_76 = arith.constant 3.200000e+01 : f32
    %196 = vector.broadcast %cst_76 : f32 to vector<16x1xf32>
    %197 = arith.divf %195, %196 : vector<16x1xf32>
    %198 = vector.broadcast %190 : vector<16x1xf32> to vector<16x32xf32>
    %199 = arith.subf %184, %198 : vector<16x32xf32>
    %cst_77 = arith.constant 9.99999996E-13 : f32
    %200 = vector.broadcast %cst_77 : f32 to vector<16x1xf32>
    %201 = arith.addf %197, %200 : vector<16x1xf32>
    %202 = math.rsqrt %201 : vector<16x1xf32>
    %203 = vector.broadcast %202 : vector<16x1xf32> to vector<16x32xf32>
    %204 = arith.mulf %199, %203 : vector<16x32xf32>
    %205 = vector.broadcast %185 : vector<1x32xf32> to vector<16x32xf32>
    %206 = arith.mulf %204, %205 : vector<16x32xf32>
    %207 = vector.broadcast %186 : vector<1x32xf32> to vector<16x32xf32>
    %208 = arith.addf %206, %207 : vector<16x32xf32>
    %209 = arith.truncf %208 : vector<16x32xf32> to vector<16x32xbf16>
    %c480 = arith.constant 480 : index
    %c0_78 = arith.constant 0 : index
    %210 = vector.load %arg2[%c480, %c0_78] : memref<640x128xbf16, #tpu.memory_space<vmem>>, vector<32x64xbf16>
    %cst_79 = arith.constant dense<0.000000e+00> : vector<16x64xf32>
    %211 = tpu.matmul %209, %210, %cst_79 {dimension_numbers = #tpu.dot_dimension_numbers<[1], [0], [0], [1], [0, 0, 1, 1], [], []>} : vector<16x32xbf16>, vector<32x64xbf16>, vector<16x64xf32> -> vector<16x64xf32>
    %c36 = arith.constant 36 : index
    %c0_80 = arith.constant 0 : index
    %212 = vector.load %arg3[%c36, %c0_80] : memref<56x128xf32, #tpu.memory_space<vmem>>, vector<1x64xf32>
    %213 = vector.broadcast %212 : vector<1x64xf32> to vector<16x64xf32>
    %214 = arith.addf %211, %213 : vector<16x64xf32>
    %215 = arith.mulf %214, %214 : vector<16x64xf32>
    %216 = arith.mulf %214, %215 : vector<16x64xf32>
    %cst_81 = arith.constant 4.471500e-02 : f32
    %217 = vector.broadcast %cst_81 : f32 to vector<16x64xf32>
    %218 = arith.mulf %217, %216 : vector<16x64xf32>
    %219 = arith.addf %214, %218 : vector<16x64xf32>
    %cst_82 = arith.constant 0.797884583 : f32
    %220 = vector.broadcast %cst_82 : f32 to vector<16x64xf32>
    %221 = arith.mulf %220, %219 : vector<16x64xf32>
    %222 = math.tanh %221 : vector<16x64xf32>
    %cst_83 = arith.constant 1.000000e+00 : f32
    %223 = vector.broadcast %cst_83 : f32 to vector<16x64xf32>
    %224 = arith.addf %223, %222 : vector<16x64xf32>
    %cst_84 = arith.constant 5.000000e-01 : f32
    %225 = vector.broadcast %cst_84 : f32 to vector<16x64xf32>
    %226 = arith.mulf %225, %224 : vector<16x64xf32>
    %227 = arith.mulf %214, %226 : vector<16x64xf32>
    %228 = arith.truncf %227 : vector<16x64xf32> to vector<16x64xbf16>
    %c512 = arith.constant 512 : index
    %c0_85 = arith.constant 0 : index
    %229 = vector.load %arg2[%c512, %c0_85] : memref<640x128xbf16, #tpu.memory_space<vmem>>, vector<64x32xbf16>
    %cst_86 = arith.constant dense<0.000000e+00> : vector<16x32xf32>
    %230 = tpu.matmul %228, %229, %cst_86 {dimension_numbers = #tpu.dot_dimension_numbers<[1], [0], [0], [1], [0, 0, 1, 1], [], []>} : vector<16x64xbf16>, vector<64x32xbf16>, vector<16x32xf32> -> vector<16x32xf32>
    %c37 = arith.constant 37 : index
    %c0_87 = arith.constant 0 : index
    %231 = vector.load %arg3[%c37, %c0_87] : memref<56x128xf32, #tpu.memory_space<vmem>>, vector<1x32xf32>
    %232 = vector.broadcast %231 : vector<1x32xf32> to vector<16x32xf32>
    %233 = arith.addf %230, %232 : vector<16x32xf32>
    %234 = arith.addf %208, %233 : vector<16x32xf32>
    %c40 = arith.constant 40 : index
    %c0_88 = arith.constant 0 : index
    %235 = vector.load %arg3[%c40, %c0_88] : memref<56x128xf32, #tpu.memory_space<vmem>>, vector<1x32xf32>
    %c41 = arith.constant 41 : index
    %c0_89 = arith.constant 0 : index
    %236 = vector.load %arg3[%c41, %c0_89] : memref<56x128xf32, #tpu.memory_space<vmem>>, vector<1x32xf32>
    %cst_90 = arith.constant dense<0.000000e+00> : vector<16xf32>
    %237 = vector.multi_reduction <add>, %234, %cst_90 [1] : vector<16x32xf32> to vector<16xf32>
    %238 = vector.shape_cast %237 : vector<16xf32> to vector<16x1xf32>
    %cst_91 = arith.constant 3.200000e+01 : f32
    %239 = vector.broadcast %cst_91 : f32 to vector<16x1xf32>
    %240 = arith.divf %238, %239 : vector<16x1xf32>
    %241 = vector.broadcast %240 : vector<16x1xf32> to vector<16x32xf32>
    %242 = arith.subf %234, %241 : vector<16x32xf32>
    %243 = arith.mulf %242, %242 : vector<16x32xf32>
    %cst_92 = arith.constant dense<0.000000e+00> : vector<16xf32>
    %244 = vector.multi_reduction <add>, %243, %cst_92 [1] : vector<16x32xf32> to vector<16xf32>
    %245 = vector.shape_cast %244 : vector<16xf32> to vector<16x1xf32>
    %cst_93 = arith.constant 3.200000e+01 : f32
    %246 = vector.broadcast %cst_93 : f32 to vector<16x1xf32>
    %247 = arith.divf %245, %246 : vector<16x1xf32>
    %248 = vector.broadcast %240 : vector<16x1xf32> to vector<16x32xf32>
    %249 = arith.subf %234, %248 : vector<16x32xf32>
    %cst_94 = arith.constant 9.99999996E-13 : f32
    %250 = vector.broadcast %cst_94 : f32 to vector<16x1xf32>
    %251 = arith.addf %247, %250 : vector<16x1xf32>
    %252 = math.rsqrt %251 : vector<16x1xf32>
    %253 = vector.broadcast %252 : vector<16x1xf32> to vector<16x32xf32>
    %254 = arith.mulf %249, %253 : vector<16x32xf32>
    %255 = vector.broadcast %235 : vector<1x32xf32> to vector<16x32xf32>
    %256 = arith.mulf %254, %255 : vector<16x32xf32>
    %257 = vector.broadcast %236 : vector<1x32xf32> to vector<16x32xf32>
    %258 = arith.addf %256, %257 : vector<16x32xf32>
    %259 = vector.extract_strided_slice %258 {offsets = [0, 0], sizes = [1, 32], strides = [1, 1]} : vector<16x32xf32> to vector<1x32xf32>
    %260 = vector.extract_strided_slice %258 {offsets = [8, 0], sizes = [1, 32], strides = [1, 1]} : vector<16x32xf32> to vector<1x32xf32>
    %261 = tpu.concatenate %259, %260 in 0 : vector<1x32xf32>, vector<1x32xf32> -> vector<2x32xf32>
    %262 = arith.truncf %261 : vector<2x32xf32> to vector<2x32xbf16>
    %c576 = arith.constant 576 : index
    %c0_95 = arith.constant 0 : index
    %263 = vector.load %arg2[%c576, %c0_95] : memref<640x128xbf16, #tpu.memory_space<vmem>>, vector<32x32xbf16>
    %cst_96 = arith.constant dense<0.000000e+00> : vector<2x32xf32>
    %264 = tpu.matmul %262, %263, %cst_96 {dimension_numbers = #tpu.dot_dimension_numbers<[1], [0], [0], [1], [0, 0, 1, 1], [], []>} : vector<2x32xbf16>, vector<32x32xbf16>, vector<2x32xf32> -> vector<2x32xf32>
    %c48 = arith.constant 48 : index
    %c0_97 = arith.constant 0 : index
    %265 = vector.load %arg3[%c48, %c0_97] : memref<56x128xf32, #tpu.memory_space<vmem>>, vector<1x32xf32>
    %266 = vector.broadcast %265 : vector<1x32xf32> to vector<2x32xf32>
    %267 = arith.addf %264, %266 : vector<2x32xf32>
    %cst_98 = arith.constant 0.000000e+00 : f32
    %268 = vector.broadcast %cst_98 : f32 to vector<2x32xf32>
    %269 = arith.maximumf %267, %268 : vector<2x32xf32>
    %270 = arith.truncf %269 : vector<2x32xf32> to vector<2x32xbf16>
    %c608 = arith.constant 608 : index
    %c0_99 = arith.constant 0 : index
    %271 = vector.load %arg2[%c608, %c0_99] : memref<640x128xbf16, #tpu.memory_space<vmem>>, vector<32x128xbf16>
    %cst_100 = arith.constant dense<0.000000e+00> : vector<2x128xf32>
    %272 = tpu.matmul %270, %271, %cst_100 {dimension_numbers = #tpu.dot_dimension_numbers<[1], [0], [0], [1], [0, 0, 1, 1], [], []>} : vector<2x32xbf16>, vector<32x128xbf16>, vector<2x128xf32> -> vector<2x128xf32>
    %c49 = arith.constant 49 : index
    %c0_101 = arith.constant 0 : index
    %273 = vector.load %arg3[%c49, %c0_101] : memref<56x128xf32, #tpu.memory_space<vmem>>, vector<1x128xf32>
    %274 = vector.broadcast %273 : vector<1x128xf32> to vector<2x128xf32>
    %275 = arith.addf %272, %274 : vector<2x128xf32>
    %c0_102 = arith.constant 0 : index
    %c0_103 = arith.constant 0 : index
    %276 = vector.load %arg4[%c0_102, %c0_103] : memref<2x128xf32, #tpu.memory_space<vmem>>, vector<2x128xf32>
    tpu.vector_store %arg4[%c0_102, %c0_103], %275 {strides = array<i32>} : memref<2x128xf32, #tpu.memory_space<vmem>>, vector<2x128xf32>,
    return
  }
}

</mosaic_0001>

<bundles_post_ra>
// kernel: _forward_train.1
= control target key start
LH: loop header
LB: loop body
LE: loop exit
PB: predicated region body
PF: predicated region fallthrough
CT: control target
= control target key end

     0   :  { %9 = vsyncpa [#allocation3], 0  ;;  %s2287_s0 = inlined_call_operand.vmem [shape: s32[16,1], index: 0, kind: input, shape index: {}]   ;;  %s2288_s1 = inlined_call_operand.vmem [shape: f32[1,16], index: 1, kind: input, shape index: {}]   ;;  %s2289_s2 = inlined_call_operand.hbm [shape: bf16[640,128], index: 2, kind: input, shape index: {}]   ;;  %s2290_s3 = inlined_call_operand.hbm [shape: f32[56,128], index: 3, kind: input, shape index: {}]   ;;  %s2291_s4 = inlined_call_operand.vmem [shape: f32[2,128], index: 4, kind: output, shape index: {}]  }
   0x1   :  { %10 = vsyncpa [#allocation5], 0  ;;  %s2038_s15 = smov [#allocation2]   ;;  %s1990_s19 = scalar_lea.hbm %s2289_s2, 5120 }
   0x2   :  { %s20_s16 = sshll.u32 %s2038_s15, 4  ;;  %p1991_p0 = scmp.ne.s32.totalorder %s2289_s2, %s1990_s19  ;;  %s21_s16 = int_to_ptr.vmem [resolvable:$true] %s20_s16 }
   0x3   :  { %p1994_p1 = scmp.lt.u32.totalorder %s1990_s19, %s2289_s2 }
   0x5   :  { %p1996_p2 = pnand %p1994_p1, %p1991_p0 }
   0x7   :  { %1999 = shalt.err (!%p1996_p2)
}
   0x8   :  { %s2000_s24 = scalar_lea.vmem %s21_s16, 5120  ;;  %p2005_p4 = scmp.lt.s32.totalorder %s21_s16, %s21_s16 }
   0x9   :  { %p2001_p3 = scmp.ne.s32.totalorder %s21_s16, %s2000_s24  ;;  %p2006_p5 = scmp.lt.s32.totalorder %s2000_s24, %s2000_s24 }
   0xb   :  { %p2007_p6 = por %p2006_p5, %p2005_p4 }
   0xd   :  { %p2008_p7 = pnand %p2007_p6, %p2001_p3 }
   0xf   :  { %2011 = shalt.err (!%p2008_p7)
}
  0x10   :  { %s2039_s25 = smov 64   ;;  %s2040_s26 = smov 4  }
  0x11   :  { %26 = dma.hbm_to_vmem [thread:$0]  %s2289_s2, 5120, %s21_s16, [#allocation3], %s2039_s25, %s2039_s25, %s2040_s26  }
  0x12   :  { %s2041_s29 = smov [#allocation4]   ;;  %s2012_s7 = scalar_lea.hbm %s2290_s3, 896 }
  0x13   :  { %s32_s30 = sshll.u32 %s2041_s29, 4  ;;  %p2013_p8 = scmp.ne.s32.totalorder %s2290_s3, %s2012_s7  ;;  %s33_s30 = int_to_ptr.vmem [resolvable:$true] %s32_s30 }
  0x14   :  { %p2016_p9 = scmp.lt.u32.totalorder %s2012_s7, %s2290_s3 }
  0x16   :  { %p2018_p10 = pnand %p2016_p9, %p2013_p8 }
  0x18   :  { %2021 = shalt.err (!%p2018_p10)
}
  0x19   :  { %s2022_s12 = scalar_lea.vmem %s33_s30, 896  ;;  %p2027_p12 = scmp.lt.s32.totalorder %s33_s30, %s33_s30 }
  0x1a   :  { %p2023_p11 = scmp.ne.s32.totalorder %s33_s30, %s2022_s12  ;;  %p2028_p13 = scmp.lt.s32.totalorder %s2022_s12, %s2022_s12 }
  0x1c   :  { %p2029_p0 = por %p2028_p13, %p2027_p12 }
  0x1e   :  { %p2030_p1 = pnand %p2029_p0, %p2023_p11 }
  0x20   :  { %2033 = shalt.err (!%p2030_p1)
}
  0x21   :  { %s2042_s2 = smov 128   ;;  %s2043_s13 = smov 8  }
  0x22   :  { %38 = dma.hbm_to_vmem [thread:$0]  %s2290_s3, 896, %s33_s30, [#allocation5], %s2042_s2, %s2042_s2, %s2043_s13  }
  0x23   :  { %2034 = dma.done.wait [#allocation3], 5120  }
  0x24   :  { %2035 = vsyncadd [#allocation3], 4294962176 }
  0x25   :  { %2036 = dma.done.wait [#allocation5], 896  }
  0x26   :  { %2037 = vsyncadd [#allocation5], 4294966400  ;;  %v48_v0 = vlaneseq  ;;  %v2044_v1 = vmov 0   ;;  %v2045_v2 = vmov 0.0   ;;  %v174_v9 = vld [vmem:[%s2288_s1] sm:$0x1] }
  0x27   :  { %1909 = vset.pattern.permute.xlu0 %v2044_v1  ;;  %1734 = vmatprep.subr.bf16.mxu0 %v2045_v2  ;;  %v46_v10 = vld [vmem:[%s2287_s0] sm:$0xff]  ;;  %vm175_vm0 = vcmp.gt.f32.partialorder %v174_v9, 0.0  ;;  %v47_v13 = vld [vmem:[%s2287_s0 + $0x8] sm:$0xff]  ;;  %v1912_v17 = vld [vmem:[#allocation2 + $0x10] sm:$0xff]   ;;  %vm2046_vm4 = vmmov 0   ;;  %vm210_vm8 = vcmask 261120  }
  0x28   :  { %v2099_v3 = vshrl.u32 %v48_v0, 7  ;;  %1754 = vmatprep.subr.bf16.mxu1 %v2045_v2  ;;  %v2103_v5 = vand.u32 127, %v48_v0  ;;  %51 = vperm.xlu0 %1909, %v46_v10   ;;  %v1910_v11 = vld [vmem:[#allocation2] sm:$0xff]   ;;  %v178_v12 = vsel %vm175_vm0, 1, %v2044_v1  ;;  %v1911_v15 = vld [vmem:[#allocation2 + $0x8] sm:$0xff]   ;;  %v1913_v18 = vld [vmem:[#allocation2 + $0x18] sm:$0xff]  }
  0x29   :  { %1735 = vmatpush3.bf16.msra.mxu0 %v1910_v11  ;;  %1750 = vmatprep.mubr.msk.bf16.mxu0 %vm2046_vm4, %v2045_v2  ;;  %v1914_v19 = vld [vmem:[#allocation2 + $0x20] sm:$0xff]   ;;  %v1915_v20 = vld [vmem:[#allocation2 + $0x28] sm:$0xff]   ;;  %v1916_v21 = vld [vmem:[#allocation2 + $0x30] sm:$0xff]   ;;  %v2047_v25 = vmov 1.0|1.0   ;;  %vm432_vm11 = vcmask 130048  }
  0x2a   :  { %v170_v4 = vadd.s32 8, %v2099_v3  ;;  %v181_v7 = vsub.s32 0, %v2099_v3  ;;  %v173_v8 = vshra.s32 %v2103_v5, 3  ;;  %1736 = vmatprep.subr.bf16.mxu0 %v2045_v2  ;;  %1758 = vmatprep.mubr.msk.bf16.mxu1 %vm2046_vm4, %v2045_v2  ;;  %v1917_v22 = vld [vmem:[#allocation2 + $0x38] sm:$0xff]   ;;  %v1918_v26 = vld [vmem:[#allocation2 + $0x40] sm:$0xff]   ;;  %v1919_v27 = vld [vmem:[#allocation2 + $0x48] sm:$0xff]  }
  0x2b   :  { %1755 = vmatpush3.bf16.msra.mxu1 %v1918_v26  ;;  %v77_v28 = vld [vmem:[#allocation4] sm:$0xff]  ;;  %v78_v30 = vld [vmem:[#allocation4 + $0x8] sm:$0xff]  ;;  %v1920_v36 = vld [vmem:[#allocation2 + $0x50] sm:$0xff]   ;;  %vm732_vm12 = vcmask 523264   ;;  %vm1449_vm13 = vcmask 1040384  }
  0x2c   :  { %v172_v6 = vshra.s32 %v170_v4, 3  ;;  %v2118_v14 = vrot.slane %v178_v12, %v181_v7  ;;  %54 = vperm.xlu0 %1909, %v47_v13   ;;  %1756 = vmatprep.subr.bf16.mxu1 %v2045_v2  ;;  %v1921_v38 = vld [vmem:[#allocation2 + $0x58] sm:$0xff]   ;;  %v1922_v39 = vld [vmem:[#allocation2 + $0x60] sm:$0xff]   ;;  %v1923_v40 = vld [vmem:[#allocation2 + $0x68] sm:$0xff]   ;;  %v171_v4 = vshra.s32 %v2099_v3, 3 }
  0x2d   :  { %1737 = vmatpush3.bf16.msra.mxu0 %v1911_v15  ;;  %v1599_v41 = vld [vmem:[#allocation4 + $0x10] ss:$0 sm:$0xff]  ;;  %v1603_v49 = vld [vmem:[#allocation4 + $0x11] ss:$0 sm:$0xff]  ;;  %v1607_v58 = vld [vmem:[#allocation4 + $0x12] ss:$0 sm:$0xff] }
  0x2e   :  { %vm177_vm1 = vcmp.eq.s32.totalorder %v172_v6, %v173_v8  ;;  %vm183_vm2 = vcmp.eq.s32.totalorder %v2118_v14, 1  ;;  %1738 = vmatprep.subr.bf16.mxu0 %v2045_v2  ;;  %vm176_vm9 = vcmp.eq.s32.totalorder %v171_v4, %v173_v8  ;;  %v2048_v7 = vmov -1e+09  }
  0x2f   :  { %vm2124_vm3 = vmand %vm177_vm1, %vm183_vm2  ;;  %1757 = vmatpush3.bf16.msra.mxu1 %v1919_v27  ;;  %v1924_v27 = vld [vmem:[#allocation2 + $0x70] sm:$0xff]  }
  0x30   :  { %1762 = vmatprep.subr.bf16.mxu1 %v2045_v2  ;;  %vm184_vm10 = vmand %vm176_vm9, %vm183_vm2  ;;  %v2179_v13 = vsel %vm2124_vm3, 0.0, %v2048_v7 }
  0x31   :  { %1739 = vmatpush3.bf16.msra.mxu0 %v1912_v17  ;;  %v2175_v9 = vsel %vm184_vm10, 0.0, %v2048_v7 }
  0x32   :  { %1740 = vmatprep.subr.bf16.mxu0 %v2045_v2 }
  0x35   :  { %1741 = vmatpush3.bf16.msra.mxu0 %v1913_v18 }
  0x36   :  { %1742 = vmatprep.subr.bf16.mxu0 %v2045_v2 }
  0x39   :  { %1743 = vmatpush3.bf16.msra.mxu0 %v1914_v19 }
  0x3a   :  { %1744 = vmatprep.subr.bf16.mxu0 %v2045_v2 }
  0x3d   :  { %1745 = vmatpush3.bf16.msra.mxu0 %v1915_v20 }
  0x3e   :  { %1746 = vmatprep.subr.bf16.mxu0 %v2045_v2 }
  0x41   :  { %1747 = vmatpush3.bf16.msra.mxu0 %v1916_v21 }
  0x42   :  { %1748 = vmatprep.subr.bf16.mxu0 %v2045_v2 }
  0x45   :  { %1749 = vmatpush3.bf16.msra.mxu0 %v1917_v22 }
  0x46   :  { %1784 = vmatprep.subr.bf16.mxu0 %v2045_v2 }
  0xa7   :  { %v52_v23 = vpop.permute.xlu0 %51 }
  0xa8   :  { %vm56_vm5 = vcmp.eq.s32.totalorder %v2103_v5, %v52_v23 }
  0xab   :  { %v55_v24 = vpop.permute.xlu0 %54 }
  0xac   :  { %vm57_vm6 = vcmp.eq.s32.totalorder %v2103_v5, %v55_v24 }
  0xad   :  { %vm1597_vm7 = vmpackc.low %vm57_vm6, %vm56_vm5 }
  0xae   :  { %1751 = vmatmul.mubr.msk.bf16.vlgmr.msra.gmra.mrb[0].mxu0 %vm1597_vm7, %v2047_v25 }
  0xaf   :  { %1786 = vmatprep.mubr.msk.bf16.mxu0 %vm2046_vm4, %v2045_v2 }
 0x181   :  { %v161_v29 = vpop.f32.mrb[0].mxu0 }
 0x182   :  { %v1752_v31 = vpop.f32.mrb[1].mxu0  ;;  %v2145_v33 = vadd.f32 %v161_v29, %v77_v28 }
 0x183   :  { %v164_v32 = vpop.f32.mrb[2].mxu0 }
 0x184   :  { %v2147_v34 = vadd.f32 %v164_v32, %v78_v30  ;;  %v1753_v35 = vpop.f32.mrb[3].mxu0 }
 0x186   :  { %v188_v37 = vpack.c.bf16 %v2147_v34, %v2145_v33 }
 0x188   :  { %1759 = vmatmul.mubr.msk.bf16.vlgmr.msra.gmra.mrb[0].mxu1 %vm210_vm8, %v188_v37 }
 0x189   :  { %1763 = vmatpush3.bf16.msra.mxu1 %v1920_v36  ;;  %1766 = vmatprep.mubr.msk.bf16.mxu1 %vm2046_vm4, %v2045_v2 }
 0x18a   :  { %1764 = vmatprep.subr.bf16.mxu1 %v2045_v2 }
 0x18d   :  { %1765 = vmatpush3.bf16.msra.mxu1 %v1921_v38 }
 0x18e   :  { %1770 = vmatprep.subr.bf16.mxu1 %v2045_v2 }
 0x190   :  { %1767 = vmatmul.mubr.msk.bf16.vlgmr.msra.gmra.mrb[4].mxu1 %vm210_vm8, %v188_v37 }
 0x191   :  { %1771 = vmatpush3.bf16.msra.mxu1 %v1922_v39  ;;  %1774 = vmatprep.mubr.msk.bf16.mxu1 %vm2046_vm4, %v2045_v2 }
 0x192   :  { %1772 = vmatprep.subr.bf16.mxu1 %v2045_v2 }
 0x195   :  { %1773 = vmatpush3.bf16.msra.mxu1 %v1923_v40 }
 0x196   :  { %1778 = vmatprep.subr.bf16.mxu1 %v2045_v2 }
 0x198   :  { %1775 = vmatmul.mubr.msk.bf16.vlgmr.msra.gmra.mrb[8].mxu1 %vm210_vm8, %v188_v37  ;;  %v1925_v37 = vld [vmem:[#allocation2 + $0x78] sm:$0xff]  }
 0x199   :  { %1780 = vmatprep.mubr.msk.bf16.mxu1 %vm2046_vm4, %v2045_v2 }
 0x25b   :  { %v248_v42 = vpop.f32.mrb[0].mxu1 }
 0x25c   :  { %v1760_v43 = vpop.f32.mrb[1].mxu1  ;;  %v249_v45 = vadd.f32 %v1599_v41, %v248_v42 }
 0x25d   :  { %v251_v44 = vpop.f32.mrb[2].mxu1  ;;  %v1613_v43 = vld [vmem:[#allocation4 + $0x13] ss:$0 sm:$0xff] }
 0x25e   :  { %v252_v46 = vadd.f32 %v1599_v41, %v251_v44  ;;  %v1761_v47 = vpop.f32.mrb[3].mxu1 }
 0x260   :  { %v379_v48 = vpack.c.bf16 %v252_v46, %v249_v45 }
 0x263   :  { %v310_v50 = vpop.f32.mrb[4].mxu1 }
 0x264   :  { %v1768_v51 = vpop.f32.mrb[5].mxu1  ;;  %v311_v53 = vadd.f32 %v1603_v49, %v310_v50 }
 0x265   :  { %v313_v52 = vpop.f32.mrb[6].mxu1 }
 0x266   :  { %v314_v54 = vadd.f32 %v1603_v49, %v313_v52  ;;  %v1769_v55 = vpop.f32.mrb[7].mxu1 }
 0x268   :  { %v380_v56 = vpack.c.bf16 %v314_v54, %v311_v53 }
 0x26a   :  { %v385_v57 = vsel %vm210_vm8, %v380_v56, 0 }
 0x26b   :  { %v372_v59 = vpop.f32.mrb[8].mxu1  ;;  %1779 = vmatpush3.bf16.xpose.msra.mxu1 %v385_v57 }
 0x26c   :  { %v1776_v60 = vpop.f32.mrb[9].mxu1  ;;  %1790 = vmatprep.subr.bf16.mxu1 %v2045_v2  ;;  %v373_v62 = vadd.f32 %v1607_v58, %v372_v59 }
 0x26d   :  { %v375_v61 = vpop.f32.mrb[10].mxu1 }
 0x26e   :  { %v376_v63 = vadd.f32 %v1607_v58, %v375_v61  ;;  %v1777_v0 = vpop.f32.mrb[11].mxu1 }
 0x270   :  { %v456_v1 = vpack.c.bf16 %v376_v63, %v373_v62  ;;  %v1926_v63 = vld [vmem:[#allocation2 + $0x80] sm:$0xff]  }
 0x272   :  { %1781 = vmatmul.mubr.msk.bf16.vlgmr.msra.gmra.mrb[12].mxu1 %vm210_vm8, %v379_v48  ;;  %1785 = vmatpush3.bf16.msra.mxu0 %v456_v1 }
 0x273   :  { %1794 = vmatprep.mubr.msk.bf16.mxu1 %vm2046_vm4, %v2045_v2  ;;  %1798 = vmatprep.subr.bf16.mxu0 %v2045_v2 }
 0x274   :  { %1791 = vmatpush3.bf16.msra.mxu1 %v1924_v27 }
 0x275   :  { %1792 = vmatprep.subr.bf16.mxu1 %v2045_v2 }
 0x278   :  { %1793 = vmatpush3.bf16.msra.mxu1 %v1925_v37 }
 0x279   :  { %1806 = vmatprep.subr.bf16.mxu1 %v2045_v2 }
 0x345   :  { %v421_v6 = vpop.f32.mrb[12].mxu1 }
 0x346   :  { %v428_v10 = vmul.f32 0.17677669, %v421_v6  ;;  %v1782_v11 = vpop.f32.mrb[13].mxu1 }
 0x347   :  { %v424_v12 = vpop.f32.mrb[14].mxu1 }
 0x348   :  { %v429_v15 = vmul.f32 0.17677669, %v424_v12  ;;  %v1783_v3 = vpop.f32.mrb[15].mxu1  ;;  %v430_v5 = vadd.f32 %v428_v10, %v2175_v9 }
 0x34a   :  { %v433_v8 = vsel %vm432_vm11, %v430_v5, -inf  ;;  %v431_v14 = vadd.f32 %v429_v15, %v2179_v13  ;;  %v1617_v15 = vld [vmem:[#allocation4 + $0x16] ss:$0 sm:$0xff] }
 0x34b   :  { %434 = vmax.xlane.f32.xlu1 %v433_v8 }
 0x34c   :  { %v436_v17 = vsel %vm432_vm11, %v431_v14, -inf }
 0x34f   :  { %437 = vmax.xlane.f32.xlu1 %v436_v17 }
 0x3d8   :  { %v435_v18 = vpop.xlane.xlu1 %434 }
 0x3d9   :  { %v439_v19 = vsub.f32 %v430_v5, %v435_v18 }
 0x3db   :  { %v441_v20 = vmul.f32 1.442695, %v439_v19 }
 0x3dc   :  { %v438_v21 = vpop.xlane.xlu1 %437 }
 0x3dd   :  { %1950 = vpow2.f32 %v441_v20  ;;  %v440_v16 = vsub.f32 %v431_v14, %v438_v21  ;;  %v1618_v14 = vld [vmem:[#allocation4 + $0x17] ss:$0 sm:$0xff] }
 0x3de   :  { %v1928_v21 = vld [vmem:[#allocation2 + $0x90] sm:$0xff]  }
 0x3df   :  { %v443_v22 = vmul.f32 1.442695, %v440_v16  ;;  %v1929_v16 = vld [vmem:[#allocation2 + $0x98] sm:$0xff]  }
 0x3e1   :  { %1952 = vpow2.f32 %v443_v22  ;;  %v1930_v22 = vld [vmem:[#allocation2 + $0xa0] sm:$0xff]  }
 0x3e7   :  { %v1951_v23 = vpop.eup %1950 }
 0x3e8   :  { %v445_v24 = vsel %vm432_vm11, %v1951_v23, 0.0 }
 0x3e9   :  { %446 = vadd.xlane.f32.xlu0 %v445_v24  ;;  %v1619_v24 = vld [vmem:[#allocation4 + $0x14] ss:$0 sm:$0xff] }
 0x3eb   :  { %v1953_v25 = vpop.eup %1952 }
 0x3ec   :  { %v448_v26 = vsel %vm432_vm11, %v1953_v25, 0.0 }
 0x3ed   :  { %449 = vadd.xlane.f32.xlu1 %v448_v26 }
 0x476   :  { %v447_v28 = vpop.xlane.xlu0 %446 }
 0x477   :  { %1954 = vrcp.f32 %v447_v28 }
 0x47a   :  { %v450_v29 = vpop.xlane.xlu1 %449 }
 0x47b   :  { %1956 = vrcp.f32 %v450_v29 }
 0x481   :  { %v1955_v30 = vpop.eup %1954 }
 0x482   :  { %v453_v32 = vmul.f32 %v1955_v30, %v1951_v23  ;;  %v1931_v23 = vld [vmem:[#allocation2 + $0xa8] sm:$0xff]  }
 0x485   :  { %v1957_v31 = vpop.eup %1956 }
 0x486   :  { %v454_v35 = vmul.f32 %v1957_v31, %v1953_v25 }
 0x488   :  { %v455_v36 = vpack.c.bf16 %v454_v35, %v453_v32 }
 0x48a   :  { %1787 = vmatmul.mubr.msk.bf16.vlgmr.msra.gmra.mrb[4].mxu0 %vm432_vm11, %v455_v36 }
 0x48b   :  { %1802 = vmatprep.mubr.msk.bf16.mxu0 %vm2046_vm4, %v2045_v2  ;;  %1799 = vmatpush3.bf16.msra.mxu0 %v1926_v63 }
 0x48c   :  { %1800 = vmatprep.subr.bf16.mxu0 %v2045_v2 }
 0x55d   :  { %v494_v38 = vpop.f32.mrb[4].mxu0 }
 0x55e   :  { %v1788_v39 = vpop.f32.mrb[5].mxu0 }
 0x55f   :  { %v497_v40 = vpop.f32.mrb[6].mxu0 }
 0x560   :  { %v501_v41 = vpack.c.bf16 %v497_v40, %v494_v38  ;;  %v1789_v42 = vpop.f32.mrb[7].mxu0 }
 0x562   :  { %1795 = vmatmul.mubr.msk.bf16.vlgmr.msra.gmra.mrb[16].mxu1 %vm210_vm8, %v501_v41 }
 0x563   :  { %1814 = vmatprep.mubr.msk.bf16.mxu1 %vm2046_vm4, %v2045_v2  ;;  %1807 = vmatpush3.bf16.msra.mxu1 %v1928_v21 }
 0x564   :  { %1808 = vmatprep.subr.bf16.mxu1 %v2045_v2 }
 0x567   :  { %1809 = vmatpush3.bf16.msra.mxu1 %v1929_v16 }
 0x568   :  { %1810 = vmatprep.subr.bf16.mxu1 %v2045_v2 }
 0x56b   :  { %1811 = vmatpush3.bf16.msra.mxu1 %v1930_v22  ;;  %v1629_v22 = vld [vmem:[#allocation4 + $0x18] ss:$0 sm:$0xff] }
 0x56c   :  { %1812 = vmatprep.subr.bf16.mxu1 %v2045_v2 }
 0x56f   :  { %1813 = vmatpush3.bf16.msra.mxu1 %v1931_v23 }
 0x570   :  { %1834 = vmatprep.subr.bf16.mxu1 %v2045_v2 }
 0x635   :  { %v560_v44 = vpop.f32.mrb[16].mxu1 }
 0x636   :  { %v561_v45 = vadd.f32 %v1613_v43, %v560_v44  ;;  %v1796_v46 = vpop.f32.mrb[17].mxu1 }
 0x637   :  { %v563_v47 = vpop.f32.mrb[18].mxu1 }
 0x638   :  { %v564_v48 = vadd.f32 %v1613_v43, %v563_v47  ;;  %v1797_v49 = vpop.f32.mrb[19].mxu1  ;;  %v567_v50 = vadd.f32 %v561_v45, %v2145_v33 }
 0x63a   :  { %v571_v51 = vsel %vm210_vm8, %v567_v50, 0.0  ;;  %v568_v52 = vadd.f32 %v564_v48, %v2147_v34  ;;  %v1927_v34 = vld [vmem:[#allocation2 + $0x88] sm:$0xff]  }
 0x63b   :  { %572 = vadd.xlane.f32.xlu1 %v571_v51  ;;  %1801 = vmatpush3.bf16.msra.mxu0 %v1927_v34 }
 0x63c   :  { %v574_v53 = vsel %vm210_vm8, %v568_v52, 0.0  ;;  %1818 = vmatprep.subr.bf16.mxu0 %v2045_v2 }
 0x63f   :  { %575 = vadd.xlane.f32.xlu1 %v574_v53 }
 0x6c8   :  { %v573_v54 = vpop.xlane.xlu1 %572 }
 0x6c9   :  { %v578_v55 = vmul.f32 0.03125, %v573_v54 }
 0x6cb   :  { %v580_v56 = vsub.f32 %v567_v50, %v578_v55 }
 0x6cc   :  { %v576_v57 = vpop.xlane.xlu1 %575 }
 0x6cd   :  { %v579_v58 = vmul.f32 0.03125, %v576_v57  ;;  %v582_v59 = vmul.f32 %v580_v56, %v580_v56 }
 0x6cf   :  { %v581_v60 = vsub.f32 %v568_v52, %v579_v58  ;;  %v584_v61 = vsel %vm210_vm8, %v582_v59, 0.0  ;;  %v1623_v52 = vld [vmem:[#allocation4 + $0x15] ss:$0 sm:$0xff] }
 0x6d0   :  { %585 = vadd.xlane.f32.xlu1 %v584_v61 }
 0x6d1   :  { %v583_v62 = vmul.f32 %v581_v60, %v581_v60 }
 0x6d3   :  { %v587_v33 = vsel %vm210_vm8, %v583_v62, 0.0 }
 0x6d4   :  { %588 = vadd.xlane.f32.xlu1 %v587_v33 }
 0x75d   :  { %v586_v0 = vpop.xlane.xlu1 %585 }
 0x75e   :  { %v590_v1 = vmul.f32 0.03125, %v586_v0 }
 0x760   :  { %v592_v4 = vadd.f32 1e-12, %v590_v1 }
 0x761   :  { %v589_v6 = vpop.xlane.xlu1 %588 }
 0x762   :  { %1958 = vrsqrt.f32 %v592_v4  ;;  %v591_v7 = vmul.f32 0.03125, %v589_v6 }
 0x764   :  { %v593_v10 = vadd.f32 1e-12, %v591_v7 }
 0x766   :  { %1960 = vrsqrt.f32 %v593_v10 }
 0x76c   :  { %v1959_v11 = vpop.eup %1958 }
 0x76d   :  { %v596_v12 = vmul.f32 %v1959_v11, %v580_v56 }
 0x76f   :  { %v602_v5 = vmul.f32 %v1617_v15, %v596_v12  ;;  %v1932_v12 = vld [vmem:[#allocation2 + $0xb0] sm:$0xff]  }
 0x770   :  { %v1961_v3 = vpop.eup %1960 }
 0x771   :  { %v597_v8 = vmul.f32 %v1961_v3, %v581_v60  ;;  %v608_v18 = vadd.f32 %v1618_v14, %v602_v5  ;;  %v1934_v3 = vld [vmem:[#allocation2 + $0xb8] sm:$0xff]  }
 0x772   :  { %v1935_v5 = vld [vmem:[#allocation2 + $0xd8] sm:$0xff]  }
 0x773   :  { %v603_v17 = vmul.f32 %v1617_v15, %v597_v8  ;;  %v1933_v15 = vld [vmem:[#allocation2 + $0xd0] sm:$0xff]  }
 0x775   :  { %v609_v19 = vadd.f32 %v1618_v14, %v603_v17 }
 0x777   :  { %v610_v20 = vpack.c.bf16 %v609_v19, %v608_v18 }
 0x779   :  { %1803 = vmatmul.mubr.msk.bf16.vlgmr.msra.gmra.mrb[8].mxu0 %vm210_vm8, %v610_v20 }
 0x77a   :  { %1822 = vmatprep.mubr.msk.bf16.mxu0 %vm2046_vm4, %v2045_v2  ;;  %1819 = vmatpush3.bf16.msra.mxu0 %v1932_v12 }
 0x77b   :  { %1820 = vmatprep.subr.bf16.mxu0 %v2045_v2 }
 0x77e   :  { %1821 = vmatpush3.bf16.msra.mxu0 %v1934_v3 }
 0x77f   :  { %1826 = vmatprep.subr.bf16.mxu0 %v2045_v2 }
 0x84c   :  { %v669_v25 = vpop.f32.mrb[8].mxu0 }
 0x84d   :  { %v670_v26 = vadd.f32 %v1619_v24, %v669_v25  ;;  %v1804_v27 = vpop.f32.mrb[9].mxu0 }
 0x84e   :  { %v672_v28 = vpop.f32.mrb[10].mxu0 }
 0x84f   :  { %v676_v29 = vmul.f32 %v670_v26, %v670_v26  ;;  %v673_v30 = vadd.f32 %v1619_v24, %v672_v28  ;;  %v1805_v31 = vpop.f32.mrb[11].mxu0 }
 0x851   :  { %v678_v32 = vmul.f32 %v676_v29, %v670_v26  ;;  %v677_v35 = vmul.f32 %v673_v30, %v673_v30 }
 0x853   :  { %v680_v36 = vmul.f32 0.044715, %v678_v32  ;;  %v679_v37 = vmul.f32 %v677_v35, %v673_v30  ;;  %v1937_v32 = vld [vmem:[#allocation2 + $0xc8] sm:$0xff]   ;;  %v1631_v35 = vld [vmem:[#allocation4 + $0x20] ss:$0 sm:$0xff] }
 0x855   :  { %v682_v38 = vadd.f32 %v680_v36, %v670_v26  ;;  %v681_v39 = vmul.f32 0.044715, %v679_v37  ;;  %v1639_v37 = vld [vmem:[#allocation4 + $0x22] ss:$0 sm:$0xff] }
 0x857   :  { %v684_v40 = vmul.f32 0.7978846, %v682_v38  ;;  %v683_v41 = vadd.f32 %v681_v39, %v673_v30 }
 0x859   :  { %1962 = vtanh.f32 %v684_v40  ;;  %v685_v42 = vmul.f32 0.7978846, %v683_v41 }
 0x85b   :  { %1964 = vtanh.f32 %v685_v42 }
 0x863   :  { %v1963_v43 = vpop.eup %1962 }
 0x864   :  { %v688_v44 = vadd.f32 1.0, %v1963_v43 }
 0x865   :  { %v1965_v45 = vpop.eup %1964 }
 0x866   :  { %v690_v46 = vmul.f32 0.5, %v688_v44  ;;  %v689_v47 = vadd.f32 1.0, %v1965_v45 }
 0x868   :  { %v691_v48 = vmul.f32 0.5, %v689_v47  ;;  %v692_v49 = vmul.f32 %v690_v46, %v670_v26  ;;  %v1630_v26 = vld [vmem:[#allocation4 + $0x19] ss:$0 sm:$0xff] }
 0x86a   :  { %v693_v50 = vmul.f32 %v691_v48, %v673_v30  ;;  %v1936_v30 = vld [vmem:[#allocation2 + $0xc0] sm:$0xff]  }
 0x86c   :  { %v694_v51 = vpack.c.bf16 %v693_v50, %v692_v49 }
 0x86e   :  { %1815 = vmatmul.mubr.msk.bf16.vlgmr.msra.gmra.mrb[20].mxu1 %vm732_vm12, %v694_v51  ;;  %v1635_v51 = vld [vmem:[#allocation4 + $0x21] ss:$0 sm:$0xff] }
 0x86f   :  { %1838 = vmatprep.mubr.msk.bf16.mxu1 %vm2046_vm4, %v2045_v2  ;;  %1835 = vmatpush3.bf16.msra.mxu1 %v1933_v15 }
 0x870   :  { %1836 = vmatprep.subr.bf16.mxu1 %v2045_v2 }
 0x873   :  { %1837 = vmatpush3.bf16.msra.mxu1 %v1935_v5 }
 0x874   :  { %1848 = vmatprep.subr.bf16.mxu1 %v2045_v2 }
 0x941   :  { %v770_v53 = vpop.f32.mrb[20].mxu1 }
 0x942   :  { %v771_v54 = vadd.f32 %v1623_v52, %v770_v53  ;;  %v1816_v55 = vpop.f32.mrb[21].mxu1 }
 0x943   :  { %v773_v56 = vpop.f32.mrb[22].mxu1 }
 0x944   :  { %v774_v57 = vadd.f32 %v1623_v52, %v773_v56  ;;  %v1817_v58 = vpop.f32.mrb[23].mxu1  ;;  %v777_v59 = vadd.f32 %v771_v54, %v608_v18 }
 0x946   :  { %v781_v60 = vsel %vm210_vm8, %v777_v59, 0.0  ;;  %v778_v61 = vadd.f32 %v774_v57, %v609_v19 }
 0x947   :  { %782 = vadd.xlane.f32.xlu1 %v781_v60 }
 0x948   :  { %v784_v62 = vsel %vm210_vm8, %v778_v61, 0.0 }
 0x94b   :  { %785 = vadd.xlane.f32.xlu1 %v784_v62 }
 0x9d4   :  { %v783_v33 = vpop.xlane.xlu1 %782 }
 0x9d5   :  { %v787_v63 = vmul.f32 0.03125, %v783_v33 }
 0x9d7   :  { %v789_v34 = vsub.f32 %v777_v59, %v787_v63 }
 0x9d8   :  { %v786_v0 = vpop.xlane.xlu1 %785 }
 0x9d9   :  { %v788_v1 = vmul.f32 0.03125, %v786_v0  ;;  %v791_v4 = vmul.f32 %v789_v34, %v789_v34 }
 0x9db   :  { %v790_v6 = vsub.f32 %v778_v61, %v788_v1  ;;  %v793_v7 = vsel %vm210_vm8, %v791_v4, 0.0 }
 0x9dc   :  { %794 = vadd.xlane.f32.xlu1 %v793_v7 }
 0x9dd   :  { %v792_v10 = vmul.f32 %v790_v6, %v790_v6 }
 0x9df   :  { %v796_v11 = vsel %vm210_vm8, %v792_v10, 0.0 }
 0x9e0   :  { %797 = vadd.xlane.f32.xlu0 %v796_v11 }
 0xa69   :  { %v795_v8 = vpop.xlane.xlu1 %794 }
 0xa6a   :  { %v799_v14 = vmul.f32 0.03125, %v795_v8 }
 0xa6c   :  { %v801_v17 = vadd.f32 1e-12, %v799_v14 }
 0xa6d   :  { %v798_v18 = vpop.xlane.xlu0 %797 }
 0xa6e   :  { %1966 = vrsqrt.f32 %v801_v17  ;;  %v800_v19 = vmul.f32 0.03125, %v798_v18 }
 0xa70   :  { %v802_v20 = vadd.f32 1e-12, %v800_v19 }
 0xa72   :  { %1968 = vrsqrt.f32 %v802_v20 }
 0xa78   :  { %v1967_v21 = vpop.eup %1966 }
 0xa79   :  { %v805_v16 = vmul.f32 %v1967_v21, %v789_v34 }
 0xa7b   :  { %v811_v24 = vmul.f32 %v1629_v22, %v805_v16 }
 0xa7c   :  { %v1969_v23 = vpop.eup %1968 }
 0xa7d   :  { %v806_v25 = vmul.f32 %v1969_v23, %v790_v6  ;;  %v2221_v28 = vadd.f32 %v1630_v26, %v811_v24  ;;  %v1939_v23 = vld [vmem:[#allocation2 + $0xe8] sm:$0xff]  }
 0xa7f   :  { %v812_v27 = vmul.f32 %v1629_v22, %v806_v25 }
 0xa81   :  { %v2223_v29 = vadd.f32 %v1630_v26, %v812_v27 }
 0xa83   :  { %v819_v31 = vpack.c.bf16 %v2223_v29, %v2221_v28 }
 0xa85   :  { %1823 = vmatmul.mubr.msk.bf16.vlgmr.msra.gmra.mrb[12].mxu0 %vm210_vm8, %v819_v31  ;;  %1839 = vmatmul.mubr.msk.bf16.vlgmr.msra.gmra.mrb[24].mxu1 %vm210_vm8, %v819_v31 }
 0xa86   :  { %1827 = vmatpush3.bf16.msra.mxu0 %v1936_v30  ;;  %1830 = vmatprep.mubr.msk.bf16.mxu0 %vm2046_vm4, %v2045_v2 }
 0xa87   :  { %1828 = vmatprep.subr.bf16.mxu0 %v2045_v2  ;;  %1850 = vmatprep.mubr.msk.bf16.mxu1 %vm2046_vm4, %v2045_v2 }
 0xa8a   :  { %1829 = vmatpush3.bf16.msra.mxu0 %v1937_v32 }
 0xa8b   :  { %1842 = vmatprep.subr.bf16.mxu0 %v2045_v2 }
 0xa8d   :  { %1831 = vmatmul.mubr.msk.bf16.vlgmr.msra.gmra.mrb[16].mxu0 %vm210_vm8, %v819_v31  ;;  %v1645_v31 = vld [vmem:[#allocation4 + $0x23] ss:$0 sm:$0xff] }
 0xa8e   :  { %1844 = vmatprep.mubr.msk.bf16.mxu0 %vm2046_vm4, %v2045_v2 }
 0xb58   :  { %v878_v36 = vpop.f32.mrb[12].mxu0  ;;  %v1002_v38 = vpop.f32.mrb[24].mxu1 }
 0xb59   :  { %v1824_v39 = vpop.f32.mrb[13].mxu0  ;;  %v1840_v40 = vpop.f32.mrb[25].mxu1  ;;  %v879_v43 = vadd.f32 %v1631_v35, %v878_v36  ;;  %v1003_v44 = vadd.f32 %v1639_v37, %v1002_v38 }
 0xb5a   :  { %v881_v41 = vpop.f32.mrb[14].mxu0  ;;  %v1005_v42 = vpop.f32.mrb[26].mxu1 }
 0xb5b   :  { %v882_v45 = vadd.f32 %v1631_v35, %v881_v41  ;;  %v1006_v46 = vadd.f32 %v1639_v37, %v1005_v42  ;;  %v1825_v47 = vpop.f32.mrb[15].mxu0  ;;  %v1841_v48 = vpop.f32.mrb[27].mxu1 }
 0xb5d   :  { %v1009_v49 = vpack.c.bf16 %v882_v45, %v879_v43  ;;  %v1085_v50 = vpack.c.bf16 %v1006_v46, %v1003_v44 }
 0xb5f   :  { %1849 = vmatpush3.bf16.msra.mxu1 %v1085_v50 }
 0xb60   :  { %v940_v52 = vpop.f32.mrb[16].mxu0  ;;  %1862 = vmatprep.subr.bf16.mxu1 %v2045_v2 }
 0xb61   :  { %v1832_v53 = vpop.f32.mrb[17].mxu0  ;;  %v941_v55 = vadd.f32 %v1635_v51, %v940_v52 }
 0xb62   :  { %v943_v54 = vpop.f32.mrb[18].mxu0  ;;  %v1940_v53 = vld [vmem:[#allocation2 + $0xf0] sm:$0xff]  }
 0xb63   :  { %v944_v56 = vadd.f32 %v1635_v51, %v943_v54  ;;  %v1833_v57 = vpop.f32.mrb[19].mxu0 }
 0xb65   :  { %v1010_v58 = vpack.c.bf16 %v944_v56, %v941_v55 }
 0xb67   :  { %v1015_v59 = vsel %vm210_vm8, %v1010_v58, 0 }
 0xb68   :  { %1843 = vmatpush3.bf16.xpose.msra.mxu0 %v1015_v59 }
 0xb69   :  { %1854 = vmatprep.subr.bf16.mxu0 %v2045_v2 }
 0xb6f   :  { %1845 = vmatmul.mubr.msk.bf16.vlgmr.msra.gmra.mrb[20].mxu0 %vm210_vm8, %v1009_v49 }
 0xb70   :  { %1858 = vmatprep.mubr.msk.bf16.mxu0 %vm2046_vm4, %v2045_v2 }
 0xc42   :  { %v1051_v60 = vpop.f32.mrb[20].mxu0 }
 0xc43   :  { %v1058_v61 = vmul.f32 0.17677669, %v1051_v60  ;;  %v1846_v62 = vpop.f32.mrb[21].mxu0 }
 0xc44   :  { %v1054_v33 = vpop.f32.mrb[22].mxu0 }
 0xc45   :  { %v1059_v63 = vmul.f32 0.17677669, %v1054_v33  ;;  %v1847_v34 = vpop.f32.mrb[23].mxu0  ;;  %v1060_v0 = vadd.f32 %v1058_v61, %v2175_v9  ;;  %v1649_v61 = vld [vmem:[#allocation4 + $0x26] ss:$0 sm:$0xff] }
 0xc47   :  { %v1062_v1 = vsel %vm432_vm11, %v1060_v0, -inf  ;;  %v1061_v4 = vadd.f32 %v1059_v63, %v2179_v13  ;;  %v1938_v13 = vld [vmem:[#allocation2 + $0xe0] sm:$0xff]  }
 0xc48   :  { %1063 = vmax.xlane.f32.xlu1 %v1062_v1  ;;  %1855 = vmatpush3.bf16.msra.mxu0 %v1938_v13 }
 0xc49   :  { %v1065_v6 = vsel %vm432_vm11, %v1061_v4, -inf  ;;  %1856 = vmatprep.subr.bf16.mxu0 %v2045_v2 }
 0xc4a   :  { %1066 = vmax.xlane.f32.xlu0 %v1065_v6 }
 0xc4c   :  { %1857 = vmatpush3.bf16.msra.mxu0 %v1939_v23 }
 0xc4d   :  { %1870 = vmatprep.subr.bf16.mxu0 %v2045_v2 }
 0xcd5   :  { %v1064_v7 = vpop.xlane.xlu1 %1063 }
 0xcd6   :  { %v1068_v10 = vsub.f32 %v1060_v0, %v1064_v7  ;;  %v1650_v0 = vld [vmem:[#allocation4 + $0x27] ss:$0 sm:$0xff] }
 0xcd7   :  { %v1067_v11 = vpop.xlane.xlu0 %1066 }
 0xcd8   :  { %v1070_v12 = vmul.f32 1.442695, %v1068_v10  ;;  %v1069_v15 = vsub.f32 %v1061_v4, %v1067_v11  ;;  %v1942_v10 = vld [vmem:[#allocation2 + $0x100] sm:$0xff]   ;;  %v1943_v11 = vld [vmem:[#allocation2 + $0x108] sm:$0xff]  }
 0xcda   :  { %1970 = vpow2.f32 %v1070_v12  ;;  %v1072_v3 = vmul.f32 1.442695, %v1069_v15  ;;  %v1944_v12 = vld [vmem:[#allocation2 + $0x110] sm:$0xff]   ;;  %v1945_v15 = vld [vmem:[#allocation2 + $0x118] sm:$0xff]  }
 0xcdc   :  { %1972 = vpow2.f32 %v1072_v3  ;;  %v1651_v3 = vld [vmem:[#allocation4 + $0x24] ss:$0 sm:$0xff] }
 0xce4   :  { %v1971_v5 = vpop.eup %1970 }
 0xce5   :  { %v1074_v8 = vsel %vm432_vm11, %v1971_v5, 0.0 }
 0xce6   :  { %v1973_v9 = vpop.eup %1972  ;;  %1075 = vadd.xlane.f32.xlu1 %v1074_v8 }
 0xce7   :  { %v1077_v14 = vsel %vm432_vm11, %v1973_v9, 0.0 }
 0xce8   :  { %1078 = vadd.xlane.f32.xlu0 %v1077_v14 }
 0xd73   :  { %v1076_v17 = vpop.xlane.xlu1 %1075 }
 0xd74   :  { %1974 = vrcp.f32 %v1076_v17 }
 0xd75   :  { %v1079_v18 = vpop.xlane.xlu0 %1078 }
 0xd76   :  { %1976 = vrcp.f32 %v1079_v18 }
 0xd7e   :  { %v1975_v19 = vpop.eup %1974 }
 0xd7f   :  { %v1082_v21 = vmul.f32 %v1975_v19, %v1971_v5 }
 0xd80   :  { %v1977_v20 = vpop.eup %1976 }
 0xd81   :  { %v1083_v16 = vmul.f32 %v1977_v20, %v1973_v9 }
 0xd83   :  { %v1084_v22 = vpack.c.bf16 %v1083_v16, %v1082_v21 }
 0xd85   :  { %1851 = vmatmul.mubr.msk.bf16.vlgmr.msra.gmra.mrb[28].mxu1 %vm432_vm11, %v1084_v22 }
 0xd86   :  { %1866 = vmatprep.mubr.msk.bf16.mxu1 %vm2046_vm4, %v2045_v2  ;;  %1863 = vmatpush3.bf16.msra.mxu1 %v1940_v53 }
 0xd87   :  { %1864 = vmatprep.subr.bf16.mxu1 %v2045_v2 }
 0xe58   :  { %v1123_v24 = vpop.f32.mrb[28].mxu1 }
 0xe59   :  { %v1852_v25 = vpop.f32.mrb[29].mxu1 }
 0xe5a   :  { %v1126_v26 = vpop.f32.mrb[30].mxu1 }
 0xe5b   :  { %v1130_v27 = vpack.c.bf16 %v1126_v26, %v1123_v24  ;;  %v1853_v30 = vpop.f32.mrb[31].mxu1 }
 0xe5d   :  { %1859 = vmatmul.mubr.msk.bf16.vlgmr.msra.gmra.mrb[24].mxu0 %vm210_vm8, %v1130_v27 }
 0xe5e   :  { %1878 = vmatprep.mubr.msk.bf16.mxu0 %vm2046_vm4, %v2045_v2  ;;  %1871 = vmatpush3.bf16.msra.mxu0 %v1942_v10 }
 0xe5f   :  { %1872 = vmatprep.subr.bf16.mxu0 %v2045_v2 }
 0xe62   :  { %1873 = vmatpush3.bf16.msra.mxu0 %v1943_v11 }
 0xe63   :  { %1874 = vmatprep.subr.bf16.mxu0 %v2045_v2 }
 0xe66   :  { %1875 = vmatpush3.bf16.msra.mxu0 %v1944_v12 }
 0xe67   :  { %1876 = vmatprep.subr.bf16.mxu0 %v2045_v2 }
 0xe6a   :  { %1877 = vmatpush3.bf16.msra.mxu0 %v1945_v15  ;;  %v1662_v15 = vld [vmem:[#allocation4 + $0x29] ss:$0 sm:$0xff] }
 0xf30   :  { %v1189_v32 = vpop.f32.mrb[24].mxu0 }
 0xf31   :  { %v1190_v35 = vadd.f32 %v1645_v31, %v1189_v32  ;;  %v1860_v36 = vpop.f32.mrb[25].mxu0 }
 0xf32   :  { %v1192_v37 = vpop.f32.mrb[26].mxu0 }
 0xf33   :  { %v1193_v38 = vadd.f32 %v1645_v31, %v1192_v37  ;;  %v1861_v39 = vpop.f32.mrb[27].mxu0  ;;  %v1196_v40 = vadd.f32 %v1190_v35, %v2221_v28 }
 0xf35   :  { %v1200_v41 = vsel %vm210_vm8, %v1196_v40, 0.0  ;;  %v1197_v42 = vadd.f32 %v1193_v38, %v2223_v29  ;;  %v1941_v29 = vld [vmem:[#allocation2 + $0xf8] sm:$0xff]  }
 0xf36   :  { %1201 = vadd.xlane.f32.xlu1 %v1200_v41  ;;  %1865 = vmatpush3.bf16.msra.mxu1 %v1941_v29 }
 0xf37   :  { %v1203_v43 = vsel %vm210_vm8, %v1197_v42, 0.0  ;;  %1882 = vmatprep.subr.bf16.mxu1 %v2045_v2 }
 0xf38   :  { %1204 = vadd.xlane.f32.xlu0 %v1203_v43 }
 0xfc3   :  { %v1202_v44 = vpop.xlane.xlu1 %1201 }
 0xfc4   :  { %v1206_v45 = vmul.f32 0.03125, %v1202_v44 }
 0xfc5   :  { %v1205_v46 = vpop.xlane.xlu0 %1204 }
 0xfc6   :  { %v1208_v47 = vsub.f32 %v1196_v40, %v1206_v45  ;;  %v1207_v48 = vmul.f32 0.03125, %v1205_v46  ;;  %v1655_v40 = vld [vmem:[#allocation4 + $0x25] ss:$0 sm:$0xff] }
 0xfc8   :  { %v1209_v49 = vsub.f32 %v1197_v42, %v1207_v48  ;;  %v1210_v50 = vmul.f32 %v1208_v47, %v1208_v47 }
 0xfca   :  { %v1212_v51 = vsel %vm210_vm8, %v1210_v50, 0.0  ;;  %v1211_v52 = vmul.f32 %v1209_v49, %v1209_v49 }
 0xfcb   :  { %1213 = vadd.xlane.f32.xlu1 %v1212_v51 }
 0xfcc   :  { %v1215_v28 = vsel %vm210_vm8, %v1211_v52, 0.0 }
 0xfcd   :  { %1216 = vadd.xlane.f32.xlu0 %v1215_v28 }
0x1058   :  { %v1214_v54 = vpop.xlane.xlu1 %1213 }
0x1059   :  { %v1218_v55 = vmul.f32 0.03125, %v1214_v54 }
0x105a   :  { %v1217_v56 = vpop.xlane.xlu0 %1216 }
0x105b   :  { %v1220_v57 = vadd.f32 1e-12, %v1218_v55  ;;  %v1219_v58 = vmul.f32 0.03125, %v1217_v56 }
0x105d   :  { %1978 = vrsqrt.f32 %v1220_v57  ;;  %v1221_v59 = vadd.f32 1e-12, %v1219_v58 }
0x105f   :  { %1980 = vrsqrt.f32 %v1221_v59  ;;  %v1946_v59 = vld [vmem:[#allocation2 + $0x120] sm:$0xff]  }
0x1067   :  { %v1979_v60 = vpop.eup %1978 }
0x1068   :  { %v1224_v62 = vmul.f32 %v1979_v60, %v1208_v47  ;;  %v1947_v60 = vld [vmem:[#allocation2 + $0x128] sm:$0xff]  }
0x1069   :  { %v1981_v33 = vpop.eup %1980 }
0x106a   :  { %v1230_v63 = vmul.f32 %v1649_v61, %v1224_v62  ;;  %v1225_v34 = vmul.f32 %v1981_v33, %v1209_v49 }
0x106c   :  { %v1231_v1 = vmul.f32 %v1649_v61, %v1225_v34  ;;  %v1236_v4 = vadd.f32 %v1650_v0, %v1230_v63 }
0x106e   :  { %v1237_v6 = vadd.f32 %v1650_v0, %v1231_v1 }
0x1070   :  { %v1238_v7 = vpack.c.bf16 %v1237_v6, %v1236_v4 }
0x1072   :  { %1867 = vmatmul.mubr.msk.bf16.vlgmr.msra.gmra.mrb[32].mxu1 %vm210_vm8, %v1238_v7  ;;  %v1661_v7 = vld [vmem:[#allocation4 + $0x28] ss:$0 sm:$0xff] }
0x1073   :  { %1886 = vmatprep.mubr.msk.bf16.mxu1 %vm2046_vm4, %v2045_v2  ;;  %1883 = vmatpush3.bf16.msra.mxu1 %v1946_v59 }
0x1074   :  { %1884 = vmatprep.subr.bf16.mxu1 %v2045_v2 }
0x1077   :  { %1885 = vmatpush3.bf16.msra.mxu1 %v1947_v60 }
0x1078   :  { %1890 = vmatprep.subr.bf16.mxu1 %v2045_v2 }
0x1145   :  { %v1297_v5 = vpop.f32.mrb[32].mxu1 }
0x1146   :  { %v1298_v8 = vadd.f32 %v1651_v3, %v1297_v5  ;;  %v1868_v9 = vpop.f32.mrb[33].mxu1 }
0x1147   :  { %v1300_v14 = vpop.f32.mrb[34].mxu1 }
0x1148   :  { %v1304_v13 = vmul.f32 %v1298_v8, %v1298_v8  ;;  %v1301_v17 = vadd.f32 %v1651_v3, %v1300_v14  ;;  %v1869_v18 = vpop.f32.mrb[35].mxu1 }
0x1149   :  { %v1663_v18 = vld [vmem:[#allocation4 + $0x30] ss:$0 sm:$0xff] }
0x114a   :  { %v1306_v19 = vmul.f32 %v1304_v13, %v1298_v8  ;;  %v1305_v20 = vmul.f32 %v1301_v17, %v1301_v17  ;;  %v1948_v13 = vld [vmem:[#allocation2 + $0x130] sm:$0xff]  }
0x114c   :  { %v1308_v21 = vmul.f32 0.044715, %v1306_v19  ;;  %v1307_v16 = vmul.f32 %v1305_v20, %v1301_v17 }
0x114e   :  { %v1310_v22 = vadd.f32 %v1308_v21, %v1298_v8  ;;  %v1309_v23 = vmul.f32 0.044715, %v1307_v16 }
0x1150   :  { %v1312_v24 = vmul.f32 0.7978846, %v1310_v22  ;;  %v1311_v25 = vadd.f32 %v1309_v23, %v1301_v17 }
0x1152   :  { %1982 = vtanh.f32 %v1312_v24  ;;  %v1313_v26 = vmul.f32 0.7978846, %v1311_v25  ;;  %v1667_v25 = vld [vmem:[#allocation4 + $0x31] ss:$0 sm:$0xff] }
0x1154   :  { %1984 = vtanh.f32 %v1313_v26 }
0x115c   :  { %v1983_v27 = vpop.eup %1982 }
0x115d   :  { %v1316_v30 = vadd.f32 1.0, %v1983_v27 }
0x115e   :  { %v1985_v31 = vpop.eup %1984 }
0x115f   :  { %v1318_v32 = vmul.f32 0.5, %v1316_v30  ;;  %v1317_v35 = vadd.f32 1.0, %v1985_v31 }
0x1161   :  { %v1319_v36 = vmul.f32 0.5, %v1317_v35  ;;  %v1320_v37 = vmul.f32 %v1318_v32, %v1298_v8 }
0x1163   :  { %v1321_v38 = vmul.f32 %v1319_v36, %v1301_v17  ;;  %v1949_v17 = vld [vmem:[#allocation2 + $0x138] sm:$0xff]  }
0x1165   :  { %v1322_v39 = vpack.c.bf16 %v1321_v38, %v1320_v37 }
0x1167   :  { %1879 = vmatmul.mubr.msk.bf16.vlgmr.msra.gmra.mrb[28].mxu0 %vm732_vm12, %v1322_v39 }
0x123a   :  { %v1397_v41 = vpop.f32.mrb[28].mxu0 }
0x123b   :  { %v1398_v42 = vadd.f32 %v1655_v40, %v1397_v41  ;;  %v1880_v43 = vpop.f32.mrb[29].mxu0 }
0x123c   :  { %v1400_v44 = vpop.f32.mrb[30].mxu0 }
0x123d   :  { %v1401_v45 = vadd.f32 %v1655_v40, %v1400_v44  ;;  %v1881_v46 = vpop.f32.mrb[31].mxu0  ;;  %v1404_v47 = vadd.f32 %v1398_v42, %v1236_v4 }
0x123f   :  { %v1408_v48 = vsel %vm210_vm8, %v1404_v47, 0.0  ;;  %v1405_v49 = vadd.f32 %v1401_v45, %v1237_v6 }
0x1240   :  { %1409 = vadd.xlane.f32.xlu0 %v1408_v48 }
0x1241   :  { %v1411_v50 = vsel %vm210_vm8, %v1405_v49, 0.0 }
0x1242   :  { %1412 = vadd.xlane.f32.xlu1 %v1411_v50 }
0x12cd   :  { %v1410_v51 = vpop.xlane.xlu0 %1409 }
0x12ce   :  { %v1414_v52 = vmul.f32 0.03125, %v1410_v51 }
0x12cf   :  { %v1413_v28 = vpop.xlane.xlu1 %1412 }
0x12d0   :  { %v1416_v53 = vsub.f32 %v1404_v47, %v1414_v52  ;;  %v1415_v29 = vmul.f32 0.03125, %v1413_v28 }
0x12d2   :  { %v1417_v54 = vsub.f32 %v1405_v49, %v1415_v29  ;;  %v1418_v55 = vmul.f32 %v1416_v53, %v1416_v53 }
0x12d4   :  { %v1420_v56 = vsel %vm210_vm8, %v1418_v55, 0.0  ;;  %v1419_v57 = vmul.f32 %v1417_v54, %v1417_v54 }
0x12d5   :  { %1421 = vadd.xlane.f32.xlu0 %v1420_v56 }
0x12d6   :  { %v1423_v58 = vsel %vm210_vm8, %v1419_v57, 0.0 }
0x12d7   :  { %1424 = vadd.xlane.f32.xlu1 %v1423_v58 }
0x1362   :  { %v1422_v61 = vpop.xlane.xlu0 %1421 }
0x1363   :  { %v1426_v62 = vmul.f32 0.03125, %v1422_v61 }
0x1364   :  { %v1425_v33 = vpop.xlane.xlu1 %1424 }
0x1365   :  { %v1428_v63 = vadd.f32 1e-12, %v1426_v62  ;;  %v1427_v34 = vmul.f32 0.03125, %v1425_v33 }
0x1367   :  { %1986 = vrsqrt.f32 %v1428_v63  ;;  %v1429_v0 = vadd.f32 1e-12, %v1427_v34 }
0x1369   :  { %1988 = vrsqrt.f32 %v1429_v0 }
0x1371   :  { %v1987_v1 = vpop.eup %1986 }
0x1372   :  { %v1432_v4 = vmul.f32 %v1987_v1, %v1416_v53 }
0x1373   :  { %v1989_v6 = vpop.eup %1988 }
0x1374   :  { %v1433_v10 = vmul.f32 %v1989_v6, %v1417_v54  ;;  %v1438_v11 = vmul.f32 %v1661_v7, %v1432_v4 }
0x1376   :  { %v1439_v12 = vmul.f32 %v1661_v7, %v1433_v10  ;;  %v1444_v5 = vadd.f32 %v1662_v15, %v1438_v11 }
0x1378   :  { %v1445_v3 = vadd.f32 %v1662_v15, %v1439_v12 }
0x137a   :  { %v1447_v8 = vrot.slane %v1445_v3, 7 }
0x137c   :  { %v1450_v9 = vsel %vm1449_vm13, %v1444_v5, %v1447_v8 }
0x137d   :  { %v1451_v14 = vpack.c.bf16 %v1450_v9, %v1450_v9 }
0x137f   :  { %1887 = vmatmul.mubr.msk.bf16.vlgmr.msra.gmra.mrb[36].mxu1 %vm210_vm8, %v1451_v14 }
0x1380   :  { %1894 = vmatprep.mubr.msk.bf16.mxu1 %vm2046_vm4, %v2045_v2  ;;  %1891 = vmatpush3.bf16.msra.mxu1 %v1948_v13 }
0x1381   :  { %1892 = vmatprep.subr.bf16.mxu1 %v2045_v2 }
0x1384   :  { %1893 = vmatpush3.bf16.msra.mxu1 %v1949_v17 }
0x1452   :  { %v1510_v19 = vpop.f32.mrb[36].mxu1 }
0x1453   :  { %v1511_v20 = vadd.f32 %v1663_v18, %v1510_v19  ;;  %v1888_v21 = vpop.f32.mrb[37].mxu1 }
0x1454   :  { %v1513_v16 = vpop.f32.mrb[38].mxu1 }
0x1455   :  { %v1516_v22 = vmax.f32 %v1511_v20, 0.0  ;;  %v1889_v23 = vpop.f32.mrb[39].mxu1 }
0x1457   :  { %v1517_v24 = vpack.c.bf16 %v1516_v22, %v1516_v22 }
0x1459   :  { %1895 = vmatmul.mubr.msk.bf16.vlgmr.msra.gmra.mrb[40].mxu1 %vm210_vm8, %v1517_v24 }
0x152c   :  { %v1576_v26 = vpop.f32.mrb[40].mxu1 }
0x152d   :  { %v1577_v27 = vadd.f32 %v1667_v25, %v1576_v26  ;;  %v1896_v30 = vpop.f32.mrb[41].mxu1 }
0x152e   :  { %v1579_v31 = vpop.f32.mrb[42].mxu1 }
0x152f   :  { %1582 = vst [vmem:[%s2291_s4] sm:$0x3] %v1577_v27  ;;  %v1897_v2 = vpop.f32.mrb[43].mxu1 }
0x1530   :  { %1587 = vsyncpa [#allocation3], 1 }
0x1531   :  { %1588 = vsyncpa [#allocation5], 1 }

</bundles_post_ra>
